<compile_context>
chip_gen: v5e
topology: v5e:2x2
jax: 0.10.0
libtpu: 0.0.40
codegen_flags: <defaults>
</compile_context>

<pallas_src>
import jax
import jax.numpy as jnp
from jax.experimental import pallas as pl
from jax.experimental.pallas import tpu as pltpu


def _round_up(x, m):
    return (x + m - 1) // m * m


# ----------------------------------------------------------------------------
# Pallas kernel: fused (1x1 conv + folded BN + ReLU) MLP chain + max-pool over
# the nsample axis. Output is channel-first (C_out, tile_pts) for lane-dense stores.
# ----------------------------------------------------------------------------
def _make_mlp_pool_kernel(n_layers: int, nsample: int, tile_pts: int):
    def kernel(x_ref, *refs):
        out_ref = refs[-1]
        wb = refs[:-1]
        # x_ref: (S, tile_pts, C_in_pad) bf16.  Collapse the leading dims
        # (layout-preserving: tile_pts % 8 == 0) -> one fused matmul per layer.
        cin = x_ref.shape[-1]
        h = x_ref[...].reshape(nsample * tile_pts, cin)
        for l in range(n_layers):
            w = wb[2 * l][...]          # (C_l, C_{l+1}) bf16
            b = wb[2 * l + 1][...]      # (1,  C_{l+1}) f32
            h = jnp.dot(h, w, preferred_element_type=jnp.float32) + b
            h = jnp.maximum(h, 0.0)     # Conv1x1 + folded BN + ReLU (f32 elementwise)
            if l + 1 < n_layers:
                h = h.astype(jnp.bfloat16)   # MXU inputs bf16, accumulate f32

        # max_pool over the nsample axis: S element-wise maxima over aligned slabs
        pooled = h[0:tile_pts, :]
        for s in range(1, nsample):
            pooled = jnp.maximum(pooled, h[s * tile_pts:(s + 1) * tile_pts, :])

        # channel-first block -> lane-dense (unmasked) stores
        out_ref[...] = pooled.T          # (C_out, tile_pts)

    return kernel


def _choose_tile_pts(R, S, cin_pad, out_channels, target=512, vmem_budget=12 * (1 << 20)):
    """Pick tile_pts (multiple of 128) so per-tile VMEM stays inside a budget."""
    maxc = max(list(out_channels) + [cin_pad])
    # bf16 input block (double-buffered) + two f32 activation slabs per point-in-tile
    per_pt = S * (2 * 2 * cin_pad + 2 * 4 * maxc)
    t = max(128, min(target, vmem_budget // max(per_pt, 1)))
    t = max(128, (t // 128) * 128)
    t = min(t, _round_up(R, 128))
    return t


def mlp_maxpool_pallas(grouped, weights, biases):
    """grouped: (S, R, C_in) f32 with R = B*npoint (sample-major layout);
    weights[l]: (C_l, C_{l+1}) f32; biases[l]: (1, C_{l+1}) f32.
    Returns pooled features channel-first: (C_out, R) f32."""
    S, R, Cin = grouped.shape
    n_layers = len(weights)
    Cout = weights[-1].shape[1]

    Cin_pad = _round_up(Cin, 8)
    tile_pts = _choose_tile_pts(R, S, Cin_pad, [w.shape[1] for w in weights])
    R_pad = _round_up(R, tile_pts)
    grid = (R_pad // tile_pts,)

    g = jnp.pad(grouped, ((0, 0), (0, R_pad - R), (0, Cin_pad - Cin))).astype(jnp.bfloat16)

    ws, bs = [], []
    for l, (w, b) in enumerate(zip(weights, biases)):
        if l == 0 and Cin_pad != Cin:
            w = jnp.pad(w, ((0, Cin_pad - Cin), (0, 0)))
        ws.append(w.astype(jnp.bfloat16))
        bs.append(b.astype(jnp.float32))

    in_specs = [pl.BlockSpec((S, tile_pts, Cin_pad), lambda i: (0, i, 0))]
    args = [g]
    for w, b in zip(ws, bs):
        in_specs.append(pl.BlockSpec(w.shape, lambda i: (0, 0)))
        in_specs.append(pl.BlockSpec(b.shape, lambda i: (0, 0)))
        args.append(w)
        args.append(b)

    out = pl.pallas_call(
        _make_mlp_pool_kernel(n_layers, S, tile_pts),
        out_shape=jax.ShapeDtypeStruct((Cout, R_pad), jnp.float32),
        grid=grid,
        in_specs=in_specs,
        out_specs=pl.BlockSpec((Cout, tile_pts), lambda i: (0, i)),
        compiler_params=pltpu.CompilerParams(
            dimension_semantics=("parallel",),
            vmem_limit_bytes=32 * 1024 * 1024,
        ),
    )(*args)
    return out[:, :R]


# ----------------------------------------------------------------------------
# Glue ops (data-dependent gathers): FPS, ball query, grouping  — plain JAX
# ----------------------------------------------------------------------------
def farthest_point_sample(xyz, npoint):
    """xyz: (B, N, 3) -> (B, npoint) int32 indices (starts from index 0, like the CUDA op)."""
    N = xyz.shape[1]

    def per_batch(pts):
        def body(i, state):
            dist, idxs, last = state
            d = jnp.sum((pts - pts[last]) ** 2, axis=-1)
            dist = jnp.minimum(dist, d)
            nxt = jnp.argmax(dist).astype(jnp.int32)
            idxs = idxs.at[i].set(nxt)
            return dist, idxs, nxt

        dist0 = jnp.full((N,), 1e10, jnp.float32)
        idxs0 = jnp.zeros((npoint,), jnp.int32)
        _, idxs, _ = jax.lax.fori_loop(1, npoint, body, (dist0, idxs0, jnp.int32(0)))
        return idxs

    return jax.vmap(per_batch)(xyz)


def ball_query(radius, nsample, xyz, new_xyz):
    """-> (B, npoint, nsample) int32; empty-ball rows fall back to index 0 (CUDA zero-init)."""
    N = xyz.shape[1]
    d2 = jnp.sum((new_xyz[:, :, None, :] - xyz[:, None, :, :]) ** 2, axis=-1)  # (B, np, N)
    in_ball = d2 < radius * radius
    order = jnp.where(in_ball, jnp.arange(N, dtype=jnp.int32)[None, None, :], N)
    sorted_idx = jnp.sort(order, axis=-1)[..., :nsample]
    first = sorted_idx[..., :1]
    first = jnp.where(first >= N, 0, first)          # no point in ball -> point 0
    idx = jnp.where(sorted_idx >= N, first, sorted_idx)
    return idx.astype(jnp.int32)


def query_and_group_smajor(radius, nsample, xyz, new_xyz, features=None, use_xyz=True):
    """-> (nsample, B*npoint, [3 +] C) sample-major grouped tensor (kernel-friendly)."""
    idx = ball_query(radius, nsample, xyz, new_xyz)        # (B, npoint, nsample)
    idx_t = jnp.transpose(idx, (0, 2, 1))                  # (B, nsample, npoint)
    gxyz = jax.vmap(lambda p, i: p[i])(xyz, idx_t) - new_xyz[:, None, :, :]  # (B, S, np, 3)
    if features is None:
        g = gxyz
    else:
        gfeat = jax.vmap(lambda f, i: f[i])(features, idx_t)                 # (B, S, np, C)
        g = jnp.concatenate([gxyz, gfeat], axis=-1) if use_xyz else gfeat
    g = jnp.transpose(g, (1, 0, 2, 3))                     # (S, B, npoint, Cin)
    return g.reshape(nsample, -1, g.shape[-1])             # (S, B*npoint, Cin)


# ----------------------------------------------------------------------------
# Module forward
# ----------------------------------------------------------------------------
def pointnet_sa_module_forward(xyz, features, params, npoint, radii, nsamples, use_pallas=True):
    B, N, _ = xyz.shape
    fps_idx = farthest_point_sample(xyz, npoint)
    new_xyz = jax.vmap(lambda p, i: p[i])(xyz, fps_idx)            # (B, npoint, 3)

    outs = []
    for g, (radius, nsample) in enumerate(zip(radii, nsamples)):
        grouped = query_and_group_smajor(radius, nsample, xyz, new_xyz, features)  # (S, R, Cin)
        ws, bs = params[g]
        if use_pallas:
            pooled_cf = mlp_maxpool_pallas(grouped, ws, bs)        # (C_out, R) channel-first
        else:
            h = grouped
            for w, b in zip(ws, bs):
                h = jnp.maximum(jnp.einsum("src,ch->srh", h, w) + b[None], 0.0)
            pooled_cf = jnp.max(h, axis=0).T                       # (C_out, R)
        outs.append(pooled_cf.reshape(-1, B, npoint))              # (C_out, B, npoint)

    new_features = jnp.concatenate(outs, axis=0)                   # (sum C_out, B, npoint)
    return new_xyz, jnp.transpose(new_features, (1, 0, 2))         # (B, sum C_out, npoint)


# ----------------------------------------------------------------------------
# Deterministic parameter construction (Conv2d 1x1, bias=False  +  BatchNorm2d folded)
# ----------------------------------------------------------------------------
def make_params(key, mlp_specs):
    params = []
    for spec in mlp_specs:
        ws, bs = [], []
        for cin, cout in zip(spec[:-1], spec[1:]):
            key, k1, k2, k3, k4, k5 = jax.random.split(key, 6)
            w = jax.random.normal(k1, (cout, cin), jnp.float32) * 0.2   # conv weight (C_out, C_in)
            gamma = 1.0 + 0.1 * jax.random.normal(k2, (cout,), jnp.float32)
            beta = 0.1 * jax.random.normal(k3, (cout,), jnp.float32)
            mean = 0.1 * jax.random.normal(k4, (cout,), jnp.float32)
            var = 1.0 + jnp.abs(0.1 * jax.random.normal(k5, (cout,), jnp.float32))
            scale = gamma / jnp.sqrt(var + 1e-5)
            w_eff = (w * scale[:, None]).T                              # (C_in, C_out)
            b_eff = (beta - mean * scale)[None, :]                      # (1, C_out)
            ws.append(w_eff)
            bs.append(b_eff)
        params.append((ws, bs))
    return params


if __name__ == "__main__":
    key = jax.random.PRNGKey(0)
    k_xyz, k_feat, k_par = jax.random.split(key, 3)

    B, N, C = 2, 64, 4
    npoint = 16
    radii = [0.5, 1.0]
    nsamples = [8, 16]
    mlp_specs = [[3 + C, 16, 32], [3 + C, 16, 32]]

    xyz = jax.random.uniform(k_xyz, (B, N, 3), jnp.float32)
    features = jax.random.normal(k_feat, (B, N, C), jnp.float32)
    params = make_params(k_par, mlp_specs)

    new_xyz, new_features = pointnet_sa_module_forward(
        xyz, features, params, npoint, radii, nsamples, use_pallas=True)
    jax.block_until_ready(new_features)

    # pure-JAX f32 reference
    ref_xyz, ref_features = pointnet_sa_module_forward(
        xyz, features, params, npoint, radii, nsamples, use_pallas=False)

    assert new_xyz.shape == (B, npoint, 3)
    assert new_features.shape == (B, sum(s[-1] for s in mlp_specs), npoint)
    assert jnp.allclose(new_xyz, ref_xyz)
    # kernel matmuls run in bf16 (f32 accumulation) -> loosened tolerance vs f32 reference
    assert jnp.allclose(new_features, ref_features, atol=5e-2, rtol=5e-2)

    print("KERNEL_OK")
</pallas_src>

<mosaic_0001>
module attributes {stable_mosaic.version = 11 : i64} {
  func.func @kernel(%arg0: i32, %arg1: memref<8x128x8xbf16, #tpu.memory_space<vmem>>, %arg2: memref<8x16xbf16, #tpu.memory_space<vmem>>, %arg3: memref<1x16xf32, #tpu.memory_space<vmem>>, %arg4: memref<16x32xbf16, #tpu.memory_space<vmem>>, %arg5: memref<1x32xf32, #tpu.memory_space<vmem>>, %arg6: memref<32x128xf32, #tpu.memory_space<vmem>>) attributes {dimension_semantics = [#tpu.dimension_semantics<parallel>], iteration_bounds = array<i64: 1>, scalar_prefetch = 0 : i64, scratch_operands = 0 : i64, tpu.core_type = #tpu.core_type<tc>, window_params = [{transform_indices = @transform_0, window_bounds = array<i64: 8, 128, 8>}, {pipeline_mode = #tpu.pipeline_mode<synchronous>, transform_indices = @transform_1, window_bounds = array<i64: 8, 16>}, {pipeline_mode = #tpu.pipeline_mode<synchronous>, transform_indices = @transform_2, window_bounds = array<i64: 1, 16>}, {pipeline_mode = #tpu.pipeline_mode<synchronous>, transform_indices = @transform_3, window_bounds = array<i64: 16, 32>}, {pipeline_mode = #tpu.pipeline_mode<synchronous>, transform_indices = @transform_4, window_bounds = array<i64: 1, 32>}, {transform_indices = @transform_5, window_bounds = array<i64: 32, 128>}]} {
    %c0 = arith.constant 0 : index
    %c0_0 = arith.constant 0 : index
    %c0_1 = arith.constant 0 : index
    %0 = vector.load %arg1[%c0, %c0_0, %c0_1] : memref<8x128x8xbf16, #tpu.memory_space<vmem>>, vector<8x128x8xbf16>
    %1 = vector.shape_cast %0 : vector<8x128x8xbf16> to vector<1024x8xbf16>
    %c0_2 = arith.constant 0 : index
    %c0_3 = arith.constant 0 : index
    %2 = vector.load %arg2[%c0_2, %c0_3] : memref<8x16xbf16, #tpu.memory_space<vmem>>, vector<8x16xbf16>
    %c0_4 = arith.constant 0 : index
    %c0_5 = arith.constant 0 : index
    %3 = vector.load %arg3[%c0_4, %c0_5] : memref<1x16xf32, #tpu.memory_space<vmem>>, vector<1x16xf32>
    %cst = arith.constant dense<0.000000e+00> : vector<1024x16xf32>
    %4 = tpu.matmul %1, %2, %cst {dimension_numbers = #tpu.dot_dimension_numbers<[1], [0], [0], [1], [0, 0, 1, 1], [], []>} : vector<1024x8xbf16>, vector<8x16xbf16>, vector<1024x16xf32> -> vector<1024x16xf32>
    %5 = vector.broadcast %3 : vector<1x16xf32> to vector<1024x16xf32>
    %6 = arith.addf %4, %5 : vector<1024x16xf32>
    %cst_6 = arith.constant 0.000000e+00 : f32
    %7 = vector.broadcast %cst_6 : f32 to vector<1024x16xf32>
    %8 = arith.maximumf %6, %7 : vector<1024x16xf32>
    %9 = arith.truncf %8 : vector<1024x16xf32> to vector<1024x16xbf16>
    %c0_7 = arith.constant 0 : index
    %c0_8 = arith.constant 0 : index
    %10 = vector.load %arg4[%c0_7, %c0_8] : memref<16x32xbf16, #tpu.memory_space<vmem>>, vector<16x32xbf16>
    %c0_9 = arith.constant 0 : index
    %c0_10 = arith.constant 0 : index
    %11 = vector.load %arg5[%c0_9, %c0_10] : memref<1x32xf32, #tpu.memory_space<vmem>>, vector<1x32xf32>
    %cst_11 = arith.constant dense<0.000000e+00> : vector<1024x32xf32>
    %12 = tpu.matmul %9, %10, %cst_11 {dimension_numbers = #tpu.dot_dimension_numbers<[1], [0], [0], [1], [0, 0, 1, 1], [], []>} : vector<1024x16xbf16>, vector<16x32xbf16>, vector<1024x32xf32> -> vector<1024x32xf32>
    %13 = vector.broadcast %11 : vector<1x32xf32> to vector<1024x32xf32>
    %14 = arith.addf %12, %13 : vector<1024x32xf32>
    %cst_12 = arith.constant 0.000000e+00 : f32
    %15 = vector.broadcast %cst_12 : f32 to vector<1024x32xf32>
    %16 = arith.maximumf %14, %15 : vector<1024x32xf32>
    %17 = vector.extract_strided_slice %16 {offsets = [0, 0], sizes = [128, 32], strides = [1, 1]} : vector<1024x32xf32> to vector<128x32xf32>
    %18 = vector.extract_strided_slice %16 {offsets = [128, 0], sizes = [128, 32], strides = [1, 1]} : vector<1024x32xf32> to vector<128x32xf32>
    %19 = arith.maximumf %17, %18 : vector<128x32xf32>
    %20 = vector.extract_strided_slice %16 {offsets = [256, 0], sizes = [128, 32], strides = [1, 1]} : vector<1024x32xf32> to vector<128x32xf32>
    %21 = arith.maximumf %19, %20 : vector<128x32xf32>
    %22 = vector.extract_strided_slice %16 {offsets = [384, 0], sizes = [128, 32], strides = [1, 1]} : vector<1024x32xf32> to vector<128x32xf32>
    %23 = arith.maximumf %21, %22 : vector<128x32xf32>
    %24 = vector.extract_strided_slice %16 {offsets = [512, 0], sizes = [128, 32], strides = [1, 1]} : vector<1024x32xf32> to vector<128x32xf32>
    %25 = arith.maximumf %23, %24 : vector<128x32xf32>
    %26 = vector.extract_strided_slice %16 {offsets = [640, 0], sizes = [128, 32], strides = [1, 1]} : vector<1024x32xf32> to vector<128x32xf32>
    %27 = arith.maximumf %25, %26 : vector<128x32xf32>
    %28 = vector.extract_strided_slice %16 {offsets = [768, 0], sizes = [128, 32], strides = [1, 1]} : vector<1024x32xf32> to vector<128x32xf32>
    %29 = arith.maximumf %27, %28 : vector<128x32xf32>
    %30 = vector.extract_strided_slice %16 {offsets = [896, 0], sizes = [128, 32], strides = [1, 1]} : vector<1024x32xf32> to vector<128x32xf32>
    %31 = arith.maximumf %29, %30 : vector<128x32xf32>
    %32 = tpu.transpose %31, [1, 0] : vector<128x32xf32> -> vector<32x128xf32>
    %c0_13 = arith.constant 0 : index
    %c0_14 = arith.constant 0 : index
    %33 = vector.load %arg6[%c0_13, %c0_14] : memref<32x128xf32, #tpu.memory_space<vmem>>, vector<32x128xf32>
    tpu.vector_store %arg6[%c0_13, %c0_14], %32 {strides = array<i32>} : memref<32x128xf32, #tpu.memory_space<vmem>>, vector<32x128xf32>,
    return
  }
  func.func @transform_0(%arg0: i32) -> (i32, i32, i32) {
    %c0_i32 = arith.constant 0 : i32
    %c0_i32_0 = arith.constant 0 : i32
    %c0_i32_1 = arith.constant 0 : i32
    return %c0_i32, %arg0, %c0_i32_0 : i32, i32, i32
  }
  func.func @transform_1(%arg0: i32) -> (i32, i32) {
    %c0_i32 = arith.constant 0 : i32
    %c0_i32_0 = arith.constant 0 : i32
    %c0_i32_1 = arith.constant 0 : i32
    return %c0_i32, %c0_i32_0 : i32, i32
  }
  func.func @transform_2(%arg0: i32) -> (i32, i32) {
    %c0_i32 = arith.constant 0 : i32
    %c0_i32_0 = arith.constant 0 : i32
    %c0_i32_1 = arith.constant 0 : i32
    return %c0_i32, %c0_i32_0 : i32, i32
  }
  func.func @transform_3(%arg0: i32) -> (i32, i32) {
    %c0_i32 = arith.constant 0 : i32
    %c0_i32_0 = arith.constant 0 : i32
    %c0_i32_1 = arith.constant 0 : i32
    return %c0_i32, %c0_i32_0 : i32, i32
  }
  func.func @transform_4(%arg0: i32) -> (i32, i32) {
    %c0_i32 = arith.constant 0 : i32
    %c0_i32_0 = arith.constant 0 : i32
    %c0_i32_1 = arith.constant 0 : i32
    return %c0_i32, %c0_i32_0 : i32, i32
  }
  func.func @transform_5(%arg0: i32) -> (i32, i32) {
    %c0_i32 = arith.constant 0 : i32
    %c0_i32_0 = arith.constant 0 : i32
    return %c0_i32, %arg0 : i32, i32
  }
}

</mosaic_0001>

<bundles_post_ra>
// kernel: tpu_custom_call.1
= control target key start
LH: loop header
LB: loop body
LE: loop exit
PB: predicated region body
PF: predicated region fallthrough
CT: control target
= control target key end

     0   :  { %vm668_vm0 = vcmask 1043456   ;;  %vm475_vm1 = vcmask 64512   ;;  %s3435_s0 = inlined_call_operand.vmem [shape: bf16[8,128,8], index: 0, kind: input, shape index: {}]   ;;  %s3436_s1 = inlined_call_operand.vmem [shape: bf16[8,16], index: 1, kind: input, shape index: {}]   ;;  %s3437_s2 = inlined_call_operand.vmem [shape: f32[1,16], index: 2, kind: input, shape index: {}]   ;;  %s3438_s3 = inlined_call_operand.vmem [shape: bf16[16,32], index: 3, kind: input, shape index: {}]   ;;  %s3439_s4 = inlined_call_operand.vmem [shape: f32[1,32], index: 4, kind: input, shape index: {}]   ;;  %s3440_s5 = inlined_call_operand.hbm [shape: f32[32,128], index: 5, kind: output, shape index: {}]  }
   0x1   :  { %v150_v0 = vld [vmem:[%s3436_s1] sm:$0xf] }
   0x2   :  { %v670_v1 = vsel %vm668_vm0, %v150_v0, 0  ;;  %v2409_v2 = vld [vmem:[%s3435_s0] sm:$0xff] }
   0x3   :  { %v2441_v3 = vld [vmem:[%s3435_s0 + $0x100] sm:$0xff]  ;;  %679 = vmatpush.bf16.msra.mxu0 %v670_v1  ;;  %2474 = vmatpush.bf16.msra.mxu2 %v670_v1 }
   0x4   :  { %10 = vsyncpa [#allocation3], 0  ;;  %v2410_v4 = vld [vmem:[%s3435_s0 + $0x8] sm:$0xff]  ;;  %v2411_v6 = vld [vmem:[%s3435_s0 + $0x10] sm:$0xff]  ;;  %vm1205_vm2 = vcmask 130048   ;;  %s2009_s1 = sshll.u32 %s3440_s5, 4  ;;  %s2010_s1 = int_to_ptr.hbm [resolvable:$true] %s2009_s1 }
   0x5   :  { %v2442_v5 = vld [vmem:[%s3435_s0 + $0x108] sm:$0xff]  ;;  %v2443_v7 = vld [vmem:[%s3435_s0 + $0x110] sm:$0xff]  ;;  %v2412_v8 = vld [vmem:[%s3435_s0 + $0x18] sm:$0xff]  ;;  %s2510_s25 = smov 128   ;;  %s2511_s26 = smov 8  }
   0x6   :  { %2277 = vmatmul.msk.bf16.vlgmr.msra.gmra.mxu0 %vm475_vm1, %v2409_v2  ;;  %2309 = vmatmul.msk.bf16.vlgmr.msra.gmra.mxu2 %vm475_vm1, %v2441_v3  ;;  %v2444_v9 = vld [vmem:[%s3435_s0 + $0x118] sm:$0xff]  ;;  %v2413_v10 = vld [vmem:[%s3435_s0 + $0x20] sm:$0xff]  ;;  %v2414_v12 = vld [vmem:[%s3435_s0 + $0x28] sm:$0xff] }
   0x7   :  { %v2445_v11 = vld [vmem:[%s3435_s0 + $0x120] sm:$0xff]  ;;  %v2446_v13 = vld [vmem:[%s3435_s0 + $0x128] sm:$0xff]  ;;  %v2415_v14 = vld [vmem:[%s3435_s0 + $0x30] sm:$0xff] }
   0x8   :  { %v2447_v15 = vld [vmem:[%s3435_s0 + $0x130] sm:$0xff]  ;;  %v2473_v16 = vld [vmem:[%s3438_s3] sm:$0xff]  ;;  %v2416_v17 = vld [vmem:[%s3435_s0 + $0x38] sm:$0xff] }
   0x9   :  { %1405 = vmatpush.bf16.msra.mxu1 %v2473_v16  ;;  %2475 = vmatpush.bf16.msra.mxu3 %v2473_v16  ;;  %v2448_v18 = vld [vmem:[%s3435_s0 + $0x138] sm:$0xff]  ;;  %v2417_v19 = vld [vmem:[%s3435_s0 + $0x40] sm:$0xff]  ;;  %v2418_v33 = vld [vmem:[%s3435_s0 + $0x48] sm:$0xff] }
   0xa   :  { %v2449_v20 = vld [vmem:[%s3435_s0 + $0x140] sm:$0xff]  ;;  %v2450_v34 = vld [vmem:[%s3435_s0 + $0x148] sm:$0xff]  ;;  %v2419_v49 = vld [vmem:[%s3435_s0 + $0x50] sm:$0xff] }
   0xb   :  { %v2621_v22 = vld [vmem:[%s3437_s2] ss:$0 sm:$0xff]  ;;  %v2451_v50 = vld [vmem:[%s3435_s0 + $0x150] sm:$0xff]  ;;  %v2420_v1 = vld [vmem:[%s3435_s0 + $0x58] sm:$0xff] }
   0xc   :  { %v2452_v2 = vld [vmem:[%s3435_s0 + $0x158] sm:$0xff] }
  0x16   :  { %2278 = vmatmul.msk.bf16.gmra.mxu0 %vm475_vm1, %v2410_v4  ;;  %2310 = vmatmul.msk.bf16.gmra.mxu2 %vm475_vm1, %v2442_v5 }
  0x26   :  { %2279 = vmatmul.msk.bf16.gmra.mxu0 %vm475_vm1, %v2411_v6  ;;  %2311 = vmatmul.msk.bf16.gmra.mxu2 %vm475_vm1, %v2443_v7 }
  0x36   :  { %2280 = vmatmul.msk.bf16.gmra.mxu0 %vm475_vm1, %v2412_v8  ;;  %2312 = vmatmul.msk.bf16.gmra.mxu2 %vm475_vm1, %v2444_v9 }
  0x46   :  { %2281 = vmatmul.msk.bf16.gmra.mxu0 %vm475_vm1, %v2413_v10  ;;  %2313 = vmatmul.msk.bf16.gmra.mxu2 %vm475_vm1, %v2445_v11 }
  0x56   :  { %2282 = vmatmul.msk.bf16.gmra.mxu0 %vm475_vm1, %v2414_v12  ;;  %2314 = vmatmul.msk.bf16.gmra.mxu2 %vm475_vm1, %v2446_v13 }
  0x66   :  { %2283 = vmatmul.msk.bf16.gmra.mxu0 %vm475_vm1, %v2415_v14  ;;  %2315 = vmatmul.msk.bf16.gmra.mxu2 %vm475_vm1, %v2447_v15 }
  0x76   :  { %2284 = vmatmul.msk.bf16.gmra.mxu0 %vm475_vm1, %v2416_v17  ;;  %2316 = vmatmul.msk.bf16.gmra.mxu2 %vm475_vm1, %v2448_v18  ;;  %v2421_v17 = vld [vmem:[%s3435_s0 + $0x60] sm:$0xff] }
  0x77   :  { %v2453_v18 = vld [vmem:[%s3435_s0 + $0x160] sm:$0xff] }
  0x83   :  { %v681_v21 = vpop.f32.mrf.mxu0 }
  0x84   :  { %v682_v24 = vadd.f32 %v2621_v22, %v681_v21 }
  0x86   :  { %2285 = vmatmul.msk.bf16.gmra.mxu0 %vm475_vm1, %v2417_v19  ;;  %2317 = vmatmul.msk.bf16.gmra.mxu2 %vm475_vm1, %v2449_v20  ;;  %v1001_v27 = vmax.f32 %v682_v24, 0.0 }
  0x89   :  { %v841_v23 = vpop.f32.mrf.mxu2 }
  0x8a   :  { %v842_v29 = vadd.f32 %v2621_v22, %v841_v23 }
  0x8b   :  { %v683_v25 = vpop.f32.mrf.mxu0 }
  0x8c   :  { %v684_v26 = vadd.f32 %v2621_v22, %v683_v25  ;;  %v1065_v36 = vmax.f32 %v842_v29, 0.0 }
  0x8e   :  { %v1002_v28 = vmax.f32 %v684_v26, 0.0 }
  0x90   :  { %v1129_v30 = vpack.c.bf16 %v1002_v28, %v1001_v27 }
  0x91   :  { %v843_v31 = vpop.f32.mrf.mxu2 }
  0x92   :  { %v844_v32 = vadd.f32 %v2621_v22, %v843_v31  ;;  %2345 = vmatmul.msk.bf16.vlgmr.msra.gmra.mxu1 %vm1205_vm2, %v1129_v30 }
  0x93   :  { %v686_v35 = vpop.f32.mrf.mxu0 }
  0x94   :  { %v1066_v37 = vmax.f32 %v844_v32, 0.0  ;;  %v687_v40 = vadd.f32 %v2621_v22, %v686_v35  ;;  %v2454_v35 = vld [vmem:[%s3435_s0 + $0x168] sm:$0xff] }
  0x96   :  { %2286 = vmatmul.msk.bf16.gmra.mxu0 %vm475_vm1, %v2418_v33  ;;  %2318 = vmatmul.msk.bf16.gmra.mxu2 %vm475_vm1, %v2450_v34  ;;  %v1161_v38 = vpack.c.bf16 %v1066_v37, %v1065_v36  ;;  %v1003_v43 = vmax.f32 %v687_v40, 0.0  ;;  %v2422_v34 = vld [vmem:[%s3435_s0 + $0x68] sm:$0xff] }
  0x98   :  { %2377 = vmatmul.msk.bf16.vlgmr.msra.gmra.mxu3 %vm1205_vm2, %v1161_v38 }
  0x99   :  { %v846_v39 = vpop.f32.mrf.mxu2 }
  0x9a   :  { %v847_v45 = vadd.f32 %v2621_v22, %v846_v39 }
  0x9b   :  { %v688_v41 = vpop.f32.mrf.mxu0 }
  0x9c   :  { %v689_v42 = vadd.f32 %v2621_v22, %v688_v41  ;;  %v1067_v52 = vmax.f32 %v847_v45, 0.0 }
  0x9e   :  { %v1004_v44 = vmax.f32 %v689_v42, 0.0 }
  0xa0   :  { %v1130_v46 = vpack.c.bf16 %v1004_v44, %v1003_v43 }
  0xa1   :  { %v848_v47 = vpop.f32.mrf.mxu2 }
  0xa2   :  { %v849_v48 = vadd.f32 %v2621_v22, %v848_v47  ;;  %2346 = vmatmul.msk.bf16.gmra.mxu1 %vm1205_vm2, %v1130_v46 }
  0xa3   :  { %v691_v51 = vpop.f32.mrf.mxu0 }
  0xa4   :  { %v1068_v53 = vmax.f32 %v849_v48, 0.0  ;;  %v692_v56 = vadd.f32 %v2621_v22, %v691_v51  ;;  %v2455_v51 = vld [vmem:[%s3435_s0 + $0x170] sm:$0xff] }
  0xa6   :  { %2287 = vmatmul.msk.bf16.gmra.mxu0 %vm475_vm1, %v2419_v49  ;;  %2319 = vmatmul.msk.bf16.gmra.mxu2 %vm475_vm1, %v2451_v50  ;;  %v1162_v54 = vpack.c.bf16 %v1068_v53, %v1067_v52  ;;  %v1005_v59 = vmax.f32 %v692_v56, 0.0  ;;  %v2423_v50 = vld [vmem:[%s3435_s0 + $0x70] sm:$0xff] }
  0xa8   :  { %2378 = vmatmul.msk.bf16.gmra.mxu3 %vm1205_vm2, %v1162_v54 }
  0xa9   :  { %v851_v55 = vpop.f32.mrf.mxu2 }
  0xaa   :  { %v852_v61 = vadd.f32 %v2621_v22, %v851_v55 }
  0xab   :  { %v693_v57 = vpop.f32.mrf.mxu0 }
  0xac   :  { %v694_v58 = vadd.f32 %v2621_v22, %v693_v57  ;;  %v1069_v4 = vmax.f32 %v852_v61, 0.0 }
  0xae   :  { %v1006_v60 = vmax.f32 %v694_v58, 0.0 }
  0xb0   :  { %v1131_v62 = vpack.c.bf16 %v1006_v60, %v1005_v59 }
  0xb1   :  { %v853_v63 = vpop.f32.mrf.mxu2 }
  0xb2   :  { %v854_v0 = vadd.f32 %v2621_v22, %v853_v63  ;;  %2347 = vmatmul.msk.bf16.gmra.mxu1 %vm1205_vm2, %v1131_v62 }
  0xb3   :  { %v696_v3 = vpop.f32.mrf.mxu0 }
  0xb4   :  { %v1070_v5 = vmax.f32 %v854_v0, 0.0  ;;  %v697_v8 = vadd.f32 %v2621_v22, %v696_v3  ;;  %v2456_v3 = vld [vmem:[%s3435_s0 + $0x178] sm:$0xff] }
  0xb6   :  { %2288 = vmatmul.msk.bf16.gmra.mxu0 %vm475_vm1, %v2420_v1  ;;  %2320 = vmatmul.msk.bf16.gmra.mxu2 %vm475_vm1, %v2452_v2  ;;  %v1163_v6 = vpack.c.bf16 %v1070_v5, %v1069_v4  ;;  %v1007_v11 = vmax.f32 %v697_v8, 0.0  ;;  %v2424_v2 = vld [vmem:[%s3435_s0 + $0x78] sm:$0xff] }
  0xb8   :  { %2379 = vmatmul.msk.bf16.gmra.mxu3 %vm1205_vm2, %v1163_v6 }
  0xb9   :  { %v856_v7 = vpop.f32.mrf.mxu2 }
  0xba   :  { %v857_v13 = vadd.f32 %v2621_v22, %v856_v7 }
  0xbb   :  { %v698_v9 = vpop.f32.mrf.mxu0 }
  0xbc   :  { %v699_v10 = vadd.f32 %v2621_v22, %v698_v9  ;;  %v1071_v20 = vmax.f32 %v857_v13, 0.0 }
  0xbe   :  { %v1008_v12 = vmax.f32 %v699_v10, 0.0 }
  0xc0   :  { %v1132_v14 = vpack.c.bf16 %v1008_v12, %v1007_v11 }
  0xc1   :  { %v858_v15 = vpop.f32.mrf.mxu2 }
  0xc2   :  { %v859_v16 = vadd.f32 %v2621_v22, %v858_v15  ;;  %2348 = vmatmul.msk.bf16.gmra.mxu1 %vm1205_vm2, %v1132_v14 }
  0xc3   :  { %v701_v19 = vpop.f32.mrf.mxu0 }
  0xc4   :  { %v1072_v21 = vmax.f32 %v859_v16, 0.0  ;;  %v702_v25 = vadd.f32 %v2621_v22, %v701_v19  ;;  %v2457_v19 = vld [vmem:[%s3435_s0 + $0x180] sm:$0xff] }
  0xc6   :  { %2289 = vmatmul.msk.bf16.gmra.mxu0 %vm475_vm1, %v2421_v17  ;;  %2321 = vmatmul.msk.bf16.gmra.mxu2 %vm475_vm1, %v2453_v18  ;;  %v1164_v23 = vpack.c.bf16 %v1072_v21, %v1071_v20  ;;  %v1009_v28 = vmax.f32 %v702_v25, 0.0  ;;  %v2425_v18 = vld [vmem:[%s3435_s0 + $0x80] sm:$0xff] }
  0xc8   :  { %2380 = vmatmul.msk.bf16.gmra.mxu3 %vm1205_vm2, %v1164_v23 }
  0xc9   :  { %v861_v24 = vpop.f32.mrf.mxu2 }
  0xca   :  { %v862_v30 = vadd.f32 %v2621_v22, %v861_v24 }
  0xcb   :  { %v703_v26 = vpop.f32.mrf.mxu0 }
  0xcc   :  { %v704_v27 = vadd.f32 %v2621_v22, %v703_v26  ;;  %v1073_v37 = vmax.f32 %v862_v30, 0.0 }
  0xce   :  { %v1010_v29 = vmax.f32 %v704_v27, 0.0 }
  0xd0   :  { %v1133_v31 = vpack.c.bf16 %v1010_v29, %v1009_v28 }
  0xd1   :  { %v863_v32 = vpop.f32.mrf.mxu2 }
  0xd2   :  { %v864_v33 = vadd.f32 %v2621_v22, %v863_v32  ;;  %2349 = vmatmul.msk.bf16.gmra.mxu1 %vm1205_vm2, %v1133_v31 }
  0xd3   :  { %v706_v36 = vpop.f32.mrf.mxu0 }
  0xd4   :  { %v1074_v38 = vmax.f32 %v864_v33, 0.0  ;;  %v707_v41 = vadd.f32 %v2621_v22, %v706_v36  ;;  %v2426_v36 = vld [vmem:[%s3435_s0 + $0x88] sm:$0xff] }
  0xd6   :  { %2290 = vmatmul.msk.bf16.gmra.mxu0 %vm475_vm1, %v2422_v34  ;;  %2322 = vmatmul.msk.bf16.gmra.mxu2 %vm475_vm1, %v2454_v35  ;;  %v1165_v39 = vpack.c.bf16 %v1074_v38, %v1073_v37  ;;  %v1011_v44 = vmax.f32 %v707_v41, 0.0  ;;  %v2458_v37 = vld [vmem:[%s3435_s0 + $0x188] sm:$0xff] }
  0xd8   :  { %2381 = vmatmul.msk.bf16.gmra.mxu3 %vm1205_vm2, %v1165_v39 }
  0xd9   :  { %v866_v40 = vpop.f32.mrf.mxu2 }
  0xda   :  { %v867_v46 = vadd.f32 %v2621_v22, %v866_v40 }
  0xdb   :  { %v708_v42 = vpop.f32.mrf.mxu0 }
  0xdc   :  { %v709_v43 = vadd.f32 %v2621_v22, %v708_v42  ;;  %v1075_v53 = vmax.f32 %v867_v46, 0.0 }
  0xde   :  { %v1012_v45 = vmax.f32 %v709_v43, 0.0 }
  0xe0   :  { %v1134_v47 = vpack.c.bf16 %v1012_v45, %v1011_v44 }
  0xe1   :  { %v868_v48 = vpop.f32.mrf.mxu2 }
  0xe2   :  { %v869_v49 = vadd.f32 %v2621_v22, %v868_v48  ;;  %2350 = vmatmul.msk.bf16.gmra.mxu1 %vm1205_vm2, %v1134_v47 }
  0xe3   :  { %v711_v52 = vpop.f32.mrf.mxu0 }
  0xe4   :  { %v1076_v54 = vmax.f32 %v869_v49, 0.0  ;;  %v712_v57 = vadd.f32 %v2621_v22, %v711_v52 }
  0xe6   :  { %2291 = vmatmul.msk.bf16.gmra.mxu0 %vm475_vm1, %v2423_v50  ;;  %2323 = vmatmul.msk.bf16.gmra.mxu2 %vm475_vm1, %v2455_v51  ;;  %v1166_v55 = vpack.c.bf16 %v1076_v54, %v1075_v53  ;;  %v1013_v60 = vmax.f32 %v712_v57, 0.0 }
  0xe8   :  { %2382 = vmatmul.msk.bf16.gmra.mxu3 %vm1205_vm2, %v1166_v55  ;;  %v2427_v55 = vld [vmem:[%s3435_s0 + $0x90] sm:$0xff] }
  0xe9   :  { %v871_v56 = vpop.f32.mrf.mxu2 }
  0xea   :  { %v872_v62 = vadd.f32 %v2621_v22, %v871_v56  ;;  %v2459_v56 = vld [vmem:[%s3435_s0 + $0x190] sm:$0xff] }
  0xeb   :  { %v713_v58 = vpop.f32.mrf.mxu0 }
  0xec   :  { %v714_v59 = vadd.f32 %v2621_v22, %v713_v58  ;;  %v1077_v5 = vmax.f32 %v872_v62, 0.0 }
  0xee   :  { %v1014_v61 = vmax.f32 %v714_v59, 0.0 }
  0xf0   :  { %v1135_v63 = vpack.c.bf16 %v1014_v61, %v1013_v60 }
  0xf1   :  { %v873_v0 = vpop.f32.mrf.mxu2 }
  0xf2   :  { %v874_v1 = vadd.f32 %v2621_v22, %v873_v0  ;;  %2351 = vmatmul.msk.bf16.gmra.mxu1 %vm1205_vm2, %v1135_v63 }
  0xf3   :  { %v716_v4 = vpop.f32.mrf.mxu0 }
  0xf4   :  { %v1078_v6 = vmax.f32 %v874_v1, 0.0  ;;  %v717_v9 = vadd.f32 %v2621_v22, %v716_v4 }
  0xf6   :  { %2292 = vmatmul.msk.bf16.gmra.mxu0 %vm475_vm1, %v2424_v2  ;;  %2324 = vmatmul.msk.bf16.gmra.mxu2 %vm475_vm1, %v2456_v3  ;;  %v1167_v7 = vpack.c.bf16 %v1078_v6, %v1077_v5  ;;  %v1015_v12 = vmax.f32 %v717_v9, 0.0 }
  0xf8   :  { %2383 = vmatmul.msk.bf16.gmra.mxu3 %vm1205_vm2, %v1167_v7 }
  0xf9   :  { %v876_v8 = vpop.f32.mrf.mxu2 }
  0xfa   :  { %v877_v14 = vadd.f32 %v2621_v22, %v876_v8 }
  0xfb   :  { %v718_v10 = vpop.f32.mrf.mxu0 }
  0xfc   :  { %v719_v11 = vadd.f32 %v2621_v22, %v718_v10  ;;  %v1079_v21 = vmax.f32 %v877_v14, 0.0 }
  0xfe   :  { %v1016_v13 = vmax.f32 %v719_v11, 0.0  ;;  %v2428_v11 = vld [vmem:[%s3435_s0 + $0x98] sm:$0xff] }
 0x100   :  { %v1136_v15 = vpack.c.bf16 %v1016_v13, %v1015_v12  ;;  %v2460_v12 = vld [vmem:[%s3435_s0 + $0x198] sm:$0xff] }
 0x101   :  { %v878_v16 = vpop.f32.mrf.mxu2 }
 0x102   :  { %v879_v17 = vadd.f32 %v2621_v22, %v878_v16  ;;  %2352 = vmatmul.msk.bf16.gmra.mxu1 %vm1205_vm2, %v1136_v15 }
 0x103   :  { %v721_v20 = vpop.f32.mrf.mxu0 }
 0x104   :  { %v1080_v23 = vmax.f32 %v879_v17, 0.0  ;;  %v722_v26 = vadd.f32 %v2621_v22, %v721_v20 }
 0x106   :  { %2293 = vmatmul.msk.bf16.gmra.mxu0 %vm475_vm1, %v2425_v18  ;;  %2325 = vmatmul.msk.bf16.gmra.mxu2 %vm475_vm1, %v2457_v19  ;;  %v1168_v24 = vpack.c.bf16 %v1080_v23, %v1079_v21  ;;  %v1017_v29 = vmax.f32 %v722_v26, 0.0 }
 0x108   :  { %2384 = vmatmul.msk.bf16.gmra.mxu3 %vm1205_vm2, %v1168_v24 }
 0x109   :  { %v881_v25 = vpop.f32.mrf.mxu2 }
 0x10a   :  { %v882_v32 = vadd.f32 %v2621_v22, %v881_v25 }
 0x10b   :  { %v723_v27 = vpop.f32.mrf.mxu0 }
 0x10c   :  { %v724_v28 = vadd.f32 %v2621_v22, %v723_v27  ;;  %v1081_v39 = vmax.f32 %v882_v32, 0.0 }
 0x10e   :  { %v1018_v30 = vmax.f32 %v724_v28, 0.0 }
 0x10f   :  { %v2739_v31 = vpop.f32.mrf.mxu1 }
 0x110   :  { %v1137_v33 = vpack.c.bf16 %v1018_v30, %v1017_v29 }
 0x111   :  { %v883_v34 = vpop.f32.mrf.mxu2 }
 0x112   :  { %v884_v35 = vadd.f32 %v2621_v22, %v883_v34  ;;  %2353 = vmatmul.msk.bf16.gmra.mxu1 %vm1205_vm2, %v1137_v33  ;;  %v2429_v33 = vld [vmem:[%s3435_s0 + $0xa0] sm:$0xff] }
 0x113   :  { %v726_v38 = vpop.f32.mrf.mxu0  ;;  %v2461_v34 = vld [vmem:[%s3435_s0 + $0x1a0] sm:$0xff] }
 0x114   :  { %v1082_v40 = vmax.f32 %v884_v35, 0.0  ;;  %v727_v44 = vadd.f32 %v2621_v22, %v726_v38 }
 0x116   :  { %2294 = vmatmul.msk.bf16.gmra.mxu0 %vm475_vm1, %v2426_v36  ;;  %2326 = vmatmul.msk.bf16.gmra.mxu2 %vm475_vm1, %v2458_v37  ;;  %v1169_v41 = vpack.c.bf16 %v1082_v40, %v1081_v39  ;;  %v1019_v48 = vmax.f32 %v727_v44, 0.0 }
 0x117   :  { %v2752_v42 = vpop.f32.mrf.mxu1 }
 0x118   :  { %2385 = vmatmul.msk.bf16.gmra.mxu3 %vm1205_vm2, %v1169_v41 }
 0x119   :  { %v886_v43 = vpop.f32.mrf.mxu2 }
 0x11a   :  { %v887_v51 = vadd.f32 %v2621_v22, %v886_v43 }
 0x11b   :  { %v728_v45 = vpop.f32.mrf.mxu0  ;;  %v2756_v46 = vpop.f32.mrf.mxu3 }
 0x11c   :  { %v729_v47 = vadd.f32 %v2621_v22, %v728_v45  ;;  %v1083_v59 = vmax.f32 %v887_v51, 0.0 }
 0x11e   :  { %v1020_v49 = vmax.f32 %v729_v47, 0.0 }
 0x11f   :  { %v2759_v50 = vpop.f32.mrf.mxu1 }
 0x120   :  { %v1138_v52 = vpack.c.bf16 %v1020_v49, %v1019_v48 }
 0x121   :  { %v888_v53 = vpop.f32.mrf.mxu2 }
 0x122   :  { %v889_v54 = vadd.f32 %v2621_v22, %v888_v53  ;;  %2354 = vmatmul.msk.bf16.gmra.mxu1 %vm1205_vm2, %v1138_v52 }
 0x123   :  { %v731_v57 = vpop.f32.mrf.mxu0  ;;  %v2770_v58 = vpop.f32.mrf.mxu3 }
 0x124   :  { %v1084_v60 = vmax.f32 %v889_v54, 0.0  ;;  %v732_v0 = vadd.f32 %v2621_v22, %v731_v57  ;;  %v2462_v57 = vld [vmem:[%s3435_s0 + $0x1a8] sm:$0xff] }
 0x126   :  { %2295 = vmatmul.msk.bf16.gmra.mxu0 %vm475_vm1, %v2427_v55  ;;  %2327 = vmatmul.msk.bf16.gmra.mxu2 %vm475_vm1, %v2459_v56  ;;  %v1170_v61 = vpack.c.bf16 %v1084_v60, %v1083_v59  ;;  %v1021_v4 = vmax.f32 %v732_v0, 0.0  ;;  %v2430_v56 = vld [vmem:[%s3435_s0 + $0xa8] sm:$0xff] }
 0x127   :  { %v2774_v62 = vpop.f32.mrf.mxu1 }
 0x128   :  { %2386 = vmatmul.msk.bf16.gmra.mxu3 %vm1205_vm2, %v1170_v61 }
 0x129   :  { %v891_v63 = vpop.f32.mrf.mxu2 }
 0x12a   :  { %v892_v7 = vadd.f32 %v2621_v22, %v891_v63 }
 0x12b   :  { %v733_v1 = vpop.f32.mrf.mxu0  ;;  %v2778_v2 = vpop.f32.mrf.mxu3 }
 0x12c   :  { %v734_v3 = vadd.f32 %v2621_v22, %v733_v1  ;;  %v1085_v15 = vmax.f32 %v892_v7, 0.0 }
 0x12e   :  { %v1022_v5 = vmax.f32 %v734_v3, 0.0 }
 0x12f   :  { %v2781_v6 = vpop.f32.mrf.mxu1 }
 0x130   :  { %v1139_v8 = vpack.c.bf16 %v1022_v5, %v1021_v4 }
 0x131   :  { %v893_v9 = vpop.f32.mrf.mxu2 }
 0x132   :  { %v894_v10 = vadd.f32 %v2621_v22, %v893_v9  ;;  %2355 = vmatmul.msk.bf16.gmra.mxu1 %vm1205_vm2, %v1139_v8 }
 0x133   :  { %v736_v13 = vpop.f32.mrf.mxu0  ;;  %v2792_v14 = vpop.f32.mrf.mxu3 }
 0x134   :  { %v1086_v16 = vmax.f32 %v894_v10, 0.0  ;;  %v737_v20 = vadd.f32 %v2621_v22, %v736_v13 }
 0x136   :  { %2296 = vmatmul.msk.bf16.gmra.mxu0 %vm475_vm1, %v2428_v11  ;;  %2328 = vmatmul.msk.bf16.gmra.mxu2 %vm475_vm1, %v2460_v12  ;;  %v1171_v17 = vpack.c.bf16 %v1086_v16, %v1085_v15  ;;  %v1023_v25 = vmax.f32 %v737_v20, 0.0 }
 0x137   :  { %v2796_v18 = vpop.f32.mrf.mxu1 }
 0x138   :  { %2387 = vmatmul.msk.bf16.gmra.mxu3 %vm1205_vm2, %v1171_v17  ;;  %v2431_v17 = vld [vmem:[%s3435_s0 + $0xb0] sm:$0xff] }
 0x139   :  { %v896_v19 = vpop.f32.mrf.mxu2 }
 0x13a   :  { %v897_v28 = vadd.f32 %v2621_v22, %v896_v19  ;;  %v2463_v19 = vld [vmem:[%s3435_s0 + $0x1b0] sm:$0xff] }
 0x13b   :  { %v738_v21 = vpop.f32.mrf.mxu0  ;;  %v2800_v23 = vpop.f32.mrf.mxu3 }
 0x13c   :  { %v739_v24 = vadd.f32 %v2621_v22, %v738_v21  ;;  %v1087_v37 = vmax.f32 %v897_v28, 0.0 }
 0x13e   :  { %v1024_v26 = vmax.f32 %v739_v24, 0.0 }
 0x13f   :  { %v2803_v27 = vpop.f32.mrf.mxu1 }
 0x140   :  { %v1140_v29 = vpack.c.bf16 %v1024_v26, %v1023_v25 }
 0x141   :  { %v898_v30 = vpop.f32.mrf.mxu2 }
 0x142   :  { %v899_v32 = vadd.f32 %v2621_v22, %v898_v30  ;;  %2356 = vmatmul.msk.bf16.gmra.mxu1 %vm1205_vm2, %v1140_v29 }
 0x143   :  { %v741_v35 = vpop.f32.mrf.mxu0  ;;  %v2814_v36 = vpop.f32.mrf.mxu3 }
 0x144   :  { %v1088_v38 = vmax.f32 %v899_v32, 0.0  ;;  %v742_v43 = vadd.f32 %v2621_v22, %v741_v35 }
 0x146   :  { %2297 = vmatmul.msk.bf16.gmra.mxu0 %vm475_vm1, %v2429_v33  ;;  %2329 = vmatmul.msk.bf16.gmra.mxu2 %vm475_vm1, %v2461_v34  ;;  %v1172_v39 = vpack.c.bf16 %v1088_v38, %v1087_v37  ;;  %v1025_v48 = vmax.f32 %v742_v43, 0.0 }
 0x147   :  { %v2818_v40 = vpop.f32.mrf.mxu1 }
 0x148   :  { %2388 = vmatmul.msk.bf16.gmra.mxu3 %vm1205_vm2, %v1172_v39 }
 0x149   :  { %v901_v41 = vpop.f32.mrf.mxu2 }
 0x14a   :  { %v902_v52 = vadd.f32 %v2621_v22, %v901_v41 }
 0x14b   :  { %v743_v44 = vpop.f32.mrf.mxu0  ;;  %v2822_v45 = vpop.f32.mrf.mxu3 }
 0x14c   :  { %v744_v47 = vadd.f32 %v2621_v22, %v743_v44  ;;  %v1089_v61 = vmax.f32 %v902_v52, 0.0 }
 0x14e   :  { %v1026_v49 = vmax.f32 %v744_v47, 0.0  ;;  %v2432_v47 = vld [vmem:[%s3435_s0 + $0xb8] sm:$0xff] }
 0x14f   :  { %v2825_v51 = vpop.f32.mrf.mxu1 }
 0x150   :  { %v1141_v53 = vpack.c.bf16 %v1026_v49, %v1025_v48  ;;  %v2464_v48 = vld [vmem:[%s3435_s0 + $0x1b8] sm:$0xff] }
 0x151   :  { %v903_v54 = vpop.f32.mrf.mxu2 }
 0x152   :  { %v904_v55 = vadd.f32 %v2621_v22, %v903_v54  ;;  %2357 = vmatmul.msk.bf16.gmra.mxu1 %vm1205_vm2, %v1141_v53 }
 0x153   :  { %v746_v59 = vpop.f32.mrf.mxu0  ;;  %v2836_v60 = vpop.f32.mrf.mxu3 }
 0x154   :  { %v1090_v63 = vmax.f32 %v904_v55, 0.0  ;;  %v747_v4 = vadd.f32 %v2621_v22, %v746_v59 }
 0x156   :  { %v1173_v0 = vpack.c.bf16 %v1090_v63, %v1089_v61  ;;  %2298 = vmatmul.msk.bf16.gmra.mxu0 %vm475_vm1, %v2430_v56  ;;  %2330 = vmatmul.msk.bf16.gmra.mxu2 %vm475_vm1, %v2462_v57  ;;  %v1027_v9 = vmax.f32 %v747_v4, 0.0 }
 0x157   :  { %v2840_v1 = vpop.f32.mrf.mxu1 }
 0x158   :  { %2389 = vmatmul.msk.bf16.gmra.mxu3 %vm1205_vm2, %v1173_v0 }
 0x159   :  { %v906_v3 = vpop.f32.mrf.mxu2 }
 0x15a   :  { %v907_v12 = vadd.f32 %v2621_v22, %v906_v3 }
 0x15b   :  { %v748_v5 = vpop.f32.mrf.mxu0  ;;  %v2844_v7 = vpop.f32.mrf.mxu3 }
 0x15c   :  { %v749_v8 = vadd.f32 %v2621_v22, %v748_v5  ;;  %v1091_v24 = vmax.f32 %v907_v12, 0.0 }
 0x15e   :  { %v1028_v10 = vmax.f32 %v749_v8, 0.0 }
 0x15f   :  { %v2847_v11 = vpop.f32.mrf.mxu1 }
 0x160   :  { %v1142_v13 = vpack.c.bf16 %v1028_v10, %v1027_v9 }
 0x161   :  { %v908_v15 = vpop.f32.mrf.mxu2 }
 0x162   :  { %v909_v16 = vadd.f32 %v2621_v22, %v908_v15  ;;  %2358 = vmatmul.msk.bf16.gmra.mxu1 %vm1205_vm2, %v1142_v13  ;;  %v2433_v13 = vld [vmem:[%s3435_s0 + $0xc0] sm:$0xff] }
 0x163   :  { %v751_v20 = vpop.f32.mrf.mxu0  ;;  %v2858_v21 = vpop.f32.mrf.mxu3  ;;  %v2465_v15 = vld [vmem:[%s3435_s0 + $0x1c0] sm:$0xff] }
 0x164   :  { %v1092_v25 = vmax.f32 %v909_v16, 0.0  ;;  %v752_v30 = vadd.f32 %v2621_v22, %v751_v20 }
 0x166   :  { %v1174_v26 = vpack.c.bf16 %v1092_v25, %v1091_v24  ;;  %2299 = vmatmul.msk.bf16.gmra.mxu0 %vm475_vm1, %v2431_v17  ;;  %2331 = vmatmul.msk.bf16.gmra.mxu2 %vm475_vm1, %v2463_v19  ;;  %v1029_v35 = vmax.f32 %v752_v30, 0.0 }
 0x167   :  { %v2862_v28 = vpop.f32.mrf.mxu1 }
 0x168   :  { %2390 = vmatmul.msk.bf16.gmra.mxu3 %vm1205_vm2, %v1174_v26 }
 0x169   :  { %v911_v29 = vpop.f32.mrf.mxu2 }
 0x16a   :  { %v912_v39 = vadd.f32 %v2621_v22, %v911_v29  ;;  %v2912_v29 = vld [vmem:[%s3439_s4] ss:$0 sm:$0xff] }
 0x16b   :  { %v753_v32 = vpop.f32.mrf.mxu0  ;;  %v2866_v33 = vpop.f32.mrf.mxu3 }
 0x16c   :  { %3441 = vst [vmem:[#allocation5_spill] sm:$0xff] %v2866_v33  ;;  %v754_v34 = vadd.f32 %v2621_v22, %v753_v32  ;;  %v1093_v53 = vmax.f32 %v912_v39, 0.0 }
 0x16e   :  { %v1030_v37 = vmax.f32 %v754_v34, 0.0 }
 0x16f   :  { %v2869_v38 = vpop.f32.mrf.mxu1 }
 0x170   :  { %v1143_v41 = vpack.c.bf16 %v1030_v37, %v1029_v35  ;;  %v1408_v37 = vadd.f32 %v2912_v29, %v2739_v31  ;;  %v2466_v31 = vld [vmem:[%s3435_s0 + $0x1c8] sm:$0xff] }
 0x171   :  { %v913_v43 = vpop.f32.mrf.mxu2 }
 0x172   :  { %v914_v44 = vadd.f32 %v2621_v22, %v913_v43  ;;  %2359 = vmatmul.msk.bf16.gmra.mxu1 %vm1205_vm2, %v1143_v41 }
 0x173   :  { %v756_v49 = vpop.f32.mrf.mxu0  ;;  %v2880_v52 = vpop.f32.mrf.mxu3 }
 0x174   :  { %3442 = vst [vmem:[#allocation6_spill] sm:$0xff] %v2880_v52  ;;  %v1094_v54 = vmax.f32 %v914_v44, 0.0  ;;  %v757_v59 = vadd.f32 %v2621_v22, %v756_v49 }
 0x176   :  { %v1175_v55 = vpack.c.bf16 %v1094_v54, %v1093_v53  ;;  %2300 = vmatmul.msk.bf16.gmra.mxu0 %vm475_vm1, %v2432_v47  ;;  %2332 = vmatmul.msk.bf16.gmra.mxu2 %vm475_vm1, %v2464_v48  ;;  %v1031_v3 = vmax.f32 %v757_v59, 0.0  ;;  %v1727_v53 = vmax.f32 %v1408_v37, 0.0 }
 0x177   :  { %v2884_v56 = vpop.f32.mrf.mxu1 }
 0x178   :  { %2391 = vmatmul.msk.bf16.gmra.mxu3 %vm1205_vm2, %v1175_v55 }
 0x179   :  { %v916_v57 = vpop.f32.mrf.mxu2 }
 0x17a   :  { %v917_v8 = vadd.f32 %v2621_v22, %v916_v57  ;;  %v2434_v57 = vld [vmem:[%s3435_s0 + $0xc8] sm:$0xff] }
 0x17b   :  { %v758_v61 = vpop.f32.mrf.mxu0  ;;  %v2888_v63 = vpop.f32.mrf.mxu3 }
 0x17c   :  { %3443 = vst [vmem:[#allocation7_spill] sm:$0xff] %v2888_v63  ;;  %v759_v0 = vadd.f32 %v2621_v22, %v758_v61  ;;  %v1095_v19 = vmax.f32 %v917_v8, 0.0  ;;  %v1410_v8 = vadd.f32 %v2912_v29, %v2752_v42 }
 0x17e   :  { %v1032_v4 = vmax.f32 %v759_v0, 0.0 }
 0x17f   :  { %v2891_v5 = vpop.f32.mrf.mxu1 }
 0x180   :  { %v1144_v9 = vpack.c.bf16 %v1032_v4, %v1031_v3 }
 0x181   :  { %v918_v10 = vpop.f32.mrf.mxu2 }
 0x182   :  { %v919_v12 = vadd.f32 %v2621_v22, %v918_v10  ;;  %2360 = vmatmul.msk.bf16.gmra.mxu1 %vm1205_vm2, %v1144_v9 }
 0x183   :  { %v761_v16 = vpop.f32.mrf.mxu0  ;;  %v2902_v17 = vpop.f32.mrf.mxu3 }
 0x184   :  { %3444 = vst [vmem:[#allocation8_spill] sm:$0xff] %v2902_v17  ;;  %v1096_v20 = vmax.f32 %v919_v12, 0.0  ;;  %v762_v30 = vadd.f32 %v2621_v22, %v761_v16 }
 0x186   :  { %v1176_v24 = vpack.c.bf16 %v1096_v20, %v1095_v19  ;;  %2301 = vmatmul.msk.bf16.gmra.mxu0 %vm475_vm1, %v2433_v13  ;;  %2333 = vmatmul.msk.bf16.gmra.mxu2 %vm475_vm1, %v2465_v15  ;;  %v1033_v39 = vmax.f32 %v762_v30, 0.0  ;;  %v1728_v15 = vmax.f32 %v1410_v8, 0.0  ;;  %v1413_v30 = vadd.f32 %v2912_v29, %v2759_v50  ;;  %v2467_v50 = vld [vmem:[%s3435_s0 + $0x1d0] sm:$0xff] }
 0x187   :  { %v2906_v25 = vpop.f32.mrf.mxu1 }
 0x188   :  { %2392 = vmatmul.msk.bf16.gmra.mxu3 %vm1205_vm2, %v1176_v24 }
 0x189   :  { %v921_v26 = vpop.f32.mrf.mxu2 }
 0x18a   :  { %v922_v44 = vadd.f32 %v2621_v22, %v921_v26 }
 0x18b   :  { %v763_v32 = vpop.f32.mrf.mxu0  ;;  %v2915_v34 = vpop.f32.mrf.mxu3 }
 0x18c   :  { %3445 = vst [vmem:[#allocation9_spill] sm:$0xff] %v2915_v34  ;;  %v764_v35 = vadd.f32 %v2621_v22, %v763_v32  ;;  %v1097_v0 = vmax.f32 %v922_v44, 0.0 }
 0x18e   :  { %v1034_v41 = vmax.f32 %v764_v35, 0.0 }
 0x18f   :  { %v1447_v43 = vpop.f32.mrf.mxu1 }
 0x190   :  { %v1145_v47 = vpack.c.bf16 %v1034_v41, %v1033_v39  ;;  %v1448_v48 = vadd.f32 %v2912_v29, %v1447_v43 }
 0x191   :  { %v923_v49 = vpop.f32.mrf.mxu2 }
 0x192   :  { %v1743_v54 = vmax.f32 %v1448_v48, 0.0  ;;  %v924_v55 = vadd.f32 %v2621_v22, %v923_v49  ;;  %2361 = vmatmul.msk.bf16.gmra.mxu1 %vm1205_vm2, %v1145_v47  ;;  %v1729_v47 = vmax.f32 %v1413_v30, 0.0 }
 0x193   :  { %v766_v59 = vpop.f32.mrf.mxu0  ;;  %v2930_v61 = vpop.f32.mrf.mxu3 }
 0x194   :  { %3446 = vst [vmem:[#allocation10_spill] sm:$0xff] %v2930_v61  ;;  %v2932_v3 = vmax.f32 %v1727_v53, %v1743_v54  ;;  %v1098_v4 = vmax.f32 %v924_v55, 0.0  ;;  %v767_v16 = vadd.f32 %v2621_v22, %v766_v59  ;;  %v2435_v53 = vld [vmem:[%s3435_s0 + $0xd0] sm:$0xff] }
 0x196   :  { %v1177_v9 = vpack.c.bf16 %v1098_v4, %v1097_v0  ;;  %2302 = vmatmul.msk.bf16.gmra.mxu0 %vm475_vm1, %v2434_v57  ;;  %2334 = vmatmul.msk.bf16.gmra.mxu2 %vm475_vm1, %v2466_v31  ;;  %v1035_v32 = vmax.f32 %v767_v16, 0.0  ;;  %v1415_v0 = vadd.f32 %v2912_v29, %v2774_v62 }
 0x197   :  { %v1449_v10 = vpop.f32.mrf.mxu1 }
 0x198   :  { %v1450_v12 = vadd.f32 %v2912_v29, %v1449_v10  ;;  %2393 = vmatmul.msk.bf16.gmra.mxu3 %vm1205_vm2, %v1177_v9 }
 0x199   :  { %v926_v13 = vpop.f32.mrf.mxu2 }
 0x19a   :  { %v1744_v19 = vmax.f32 %v1450_v12, 0.0  ;;  %v927_v39 = vadd.f32 %v2621_v22, %v926_v13  ;;  %v1730_v12 = vmax.f32 %v1415_v0, 0.0  ;;  %v1420_v0 = vadd.f32 %v2912_v29, %v2796_v18 }
 0x19b   :  { %v768_v20 = vpop.f32.mrf.mxu0  ;;  %v2941_v24 = vpop.f32.mrf.mxu3 }
 0x19c   :  { %v2943_v26 = vmax.f32 %v1728_v15, %v1744_v19  ;;  %v769_v42 = vadd.f32 %v2621_v22, %v768_v20  ;;  %v1099_v57 = vmax.f32 %v927_v39, 0.0 }
 0x19e   :  { %v1036_v35 = vmax.f32 %v769_v42, 0.0  ;;  %v1418_v42 = vadd.f32 %v2912_v29, %v2781_v6  ;;  %v2468_v6 = vld [vmem:[%s3435_s0 + $0x1d8] sm:$0xff] }
 0x19f   :  { %v1452_v37 = vpop.f32.mrf.mxu1 }
 0x1a0   :  { %v1146_v41 = vpack.c.bf16 %v1036_v35, %v1035_v32  ;;  %v1453_v43 = vadd.f32 %v2912_v29, %v1452_v37 }
 0x1a1   :  { %v928_v44 = vpop.f32.mrf.mxu2 }
 0x1a2   :  { %v1745_v48 = vmax.f32 %v1453_v43, 0.0  ;;  %v929_v49 = vadd.f32 %v2621_v22, %v928_v44  ;;  %2362 = vmatmul.msk.bf16.gmra.mxu1 %vm1205_vm2, %v1146_v41  ;;  %v1731_v44 = vmax.f32 %v1418_v42, 0.0 }
 0x1a3   :  { %v771_v54 = vpop.f32.mrf.mxu0  ;;  %v2958_v55 = vpop.f32.mrf.mxu3 }
 0x1a4   :  { %v2960_v31 = vmax.f32 %v1729_v47, %v1745_v48  ;;  %v1100_v59 = vmax.f32 %v929_v49, 0.0  ;;  %v772_v13 = vadd.f32 %v2621_v22, %v771_v54  ;;  %v2436_v49 = vld [vmem:[%s3435_s0 + $0xd8] sm:$0xff] }
 0x1a6   :  { %v1178_v4 = vpack.c.bf16 %v1100_v59, %v1099_v57  ;;  %2303 = vmatmul.msk.bf16.gmra.mxu0 %vm475_vm1, %v2435_v53  ;;  %2335 = vmatmul.msk.bf16.gmra.mxu2 %vm475_vm1, %v2467_v50  ;;  %v1037_v30 = vmax.f32 %v772_v13, 0.0 }
 0x1a7   :  { %v1454_v8 = vpop.f32.mrf.mxu1 }
 0x1a8   :  { %v1455_v9 = vadd.f32 %v2912_v29, %v1454_v8  ;;  %2394 = vmatmul.msk.bf16.gmra.mxu3 %vm1205_vm2, %v1178_v4 }
 0x1a9   :  { %v931_v10 = vpop.f32.mrf.mxu2 }
 0x1aa   :  { %v1746_v15 = vmax.f32 %v1455_v9, 0.0  ;;  %v932_v37 = vadd.f32 %v2621_v22, %v931_v10 }
 0x1ab   :  { %v773_v16 = vpop.f32.mrf.mxu0  ;;  %v2969_v19 = vpop.f32.mrf.mxu3 }
 0x1ac   :  { %v2971_v20 = vmax.f32 %v1730_v12, %v1746_v15  ;;  %v774_v62 = vadd.f32 %v2621_v22, %v773_v16  ;;  %v1101_v54 = vmax.f32 %v932_v37, 0.0  ;;  %v1732_v12 = vmax.f32 %v1420_v0, 0.0 }
 0x1ae   :  { %v1038_v32 = vmax.f32 %v774_v62, 0.0 }
 0x1af   :  { %v1457_v35 = vpop.f32.mrf.mxu1 }
 0x1b0   :  { %v1147_v39 = vpack.c.bf16 %v1038_v32, %v1037_v30  ;;  %v1458_v41 = vadd.f32 %v2912_v29, %v1457_v35  ;;  %v1423_v30 = vadd.f32 %v2912_v29, %v2803_v27  ;;  %v2469_v27 = vld [vmem:[%s3435_s0 + $0x1e0] sm:$0xff] }
 0x1b1   :  { %v933_v43 = vpop.f32.mrf.mxu2 }
 0x1b2   :  { %v1747_v47 = vmax.f32 %v1458_v41, 0.0  ;;  %v934_v48 = vadd.f32 %v2621_v22, %v933_v43  ;;  %2363 = vmatmul.msk.bf16.gmra.mxu1 %vm1205_vm2, %v1147_v39 }
 0x1b3   :  { %v776_v53 = vpop.f32.mrf.mxu0  ;;  %v2986_v50 = vpop.f32.mrf.mxu3 }
 0x1b4   :  { %v2988_v57 = vmax.f32 %v1731_v44, %v1747_v47  ;;  %v1102_v59 = vmax.f32 %v934_v48, 0.0  ;;  %v777_v13 = vadd.f32 %v2621_v22, %v776_v53  ;;  %v1733_v47 = vmax.f32 %v1423_v30, 0.0 }
 0x1b6   :  { %v1179_v4 = vpack.c.bf16 %v1102_v59, %v1101_v54  ;;  %2304 = vmatmul.msk.bf16.gmra.mxu0 %vm475_vm1, %v2436_v49  ;;  %2336 = vmatmul.msk.bf16.gmra.mxu2 %vm475_vm1, %v2468_v6  ;;  %v1039_v32 = vmax.f32 %v777_v13, 0.0  ;;  %v2437_v6 = vld [vmem:[%s3435_s0 + $0xe0] sm:$0xff] }
 0x1b7   :  { %v1459_v8 = vpop.f32.mrf.mxu1 }
 0x1b8   :  { %v1460_v9 = vadd.f32 %v2912_v29, %v1459_v8  ;;  %2395 = vmatmul.msk.bf16.gmra.mxu3 %vm1205_vm2, %v1179_v4  ;;  %v1425_v8 = vadd.f32 %v2912_v29, %v2818_v40 }
 0x1b9   :  { %v936_v10 = vpop.f32.mrf.mxu2 }
 0x1ba   :  { %v1748_v15 = vmax.f32 %v1460_v9, 0.0  ;;  %v937_v39 = vadd.f32 %v2621_v22, %v936_v10 }
 0x1bb   :  { %v778_v16 = vpop.f32.mrf.mxu0  ;;  %v2997_v62 = vpop.f32.mrf.mxu3 }
 0x1bc   :  { %v2999_v42 = vmax.f32 %v1732_v12, %v1748_v15  ;;  %v779_v18 = vadd.f32 %v2621_v22, %v778_v16  ;;  %v1103_v59 = vmax.f32 %v937_v39, 0.0  ;;  %v1734_v15 = vmax.f32 %v1425_v8, 0.0 }
 0x1be   :  { %v1040_v35 = vmax.f32 %v779_v18, 0.0 }
 0x1bf   :  { %v1462_v37 = vpop.f32.mrf.mxu1 }
 0x1c0   :  { %v1148_v41 = vpack.c.bf16 %v1040_v35, %v1039_v32  ;;  %v1463_v43 = vadd.f32 %v2912_v29, %v1462_v37  ;;  %v1428_v37 = vadd.f32 %v2912_v29, %v2825_v51  ;;  %v2470_v51 = vld [vmem:[%s3435_s0 + $0x1e8] sm:$0xff] }
 0x1c1   :  { %v938_v44 = vpop.f32.mrf.mxu2 }
 0x1c2   :  { %v1749_v48 = vmax.f32 %v1463_v43, 0.0  ;;  %v939_v49 = vadd.f32 %v2621_v22, %v938_v44  ;;  %2364 = vmatmul.msk.bf16.gmra.mxu1 %vm1205_vm2, %v1148_v41 }
 0x1c3   :  { %v781_v53 = vpop.f32.mrf.mxu0  ;;  %v3014_v54 = vpop.f32.mrf.mxu3 }
 0x1c4   :  { %v3016_v0 = vmax.f32 %v1733_v47, %v1749_v48  ;;  %v1104_v4 = vmax.f32 %v939_v49, 0.0  ;;  %v782_v16 = vadd.f32 %v2621_v22, %v781_v53 }
 0x1c6   :  { %v1180_v9 = vpack.c.bf16 %v1104_v4, %v1103_v59  ;;  %2305 = vmatmul.msk.bf16.gmra.mxu0 %vm475_vm1, %v2437_v6  ;;  %2337 = vmatmul.msk.bf16.gmra.mxu2 %vm475_vm1, %v2469_v27  ;;  %v1041_v39 = vmax.f32 %v782_v16, 0.0  ;;  %v1735_v6 = vmax.f32 %v1428_v37, 0.0  ;;  %v2438_v59 = vld [vmem:[%s3435_s0 + $0xe8] sm:$0xff] }
 0x1c7   :  { %v1464_v10 = vpop.f32.mrf.mxu1 }
 0x1c8   :  { %v1465_v12 = vadd.f32 %v2912_v29, %v1464_v10  ;;  %2396 = vmatmul.msk.bf16.gmra.mxu3 %vm1205_vm2, %v1180_v9 }
 0x1c9   :  { %v941_v13 = vpop.f32.mrf.mxu2 }
 0x1ca   :  { %v1750_v18 = vmax.f32 %v1465_v12, 0.0  ;;  %v942_v44 = vadd.f32 %v2621_v22, %v941_v13 }
 0x1cb   :  { %v783_v30 = vpop.f32.mrf.mxu0  ;;  %v3025_v32 = vpop.f32.mrf.mxu3 }
 0x1cc   :  { %v3027_v35 = vmax.f32 %v1734_v15, %v1750_v18  ;;  %v784_v40 = vadd.f32 %v2621_v22, %v783_v30  ;;  %v1105_v9 = vmax.f32 %v942_v44, 0.0 }
 0x1ce   :  { %v1042_v41 = vmax.f32 %v784_v40, 0.0  ;;  %v3055_v40 = vld [vmem:[%s3437_s2] ss:$0 sm:$0xff] }
 0x1cf   :  { %v1467_v43 = vpop.f32.mrf.mxu1 }
 0x1d0   :  { %v1149_v47 = vpack.c.bf16 %v1042_v41, %v1041_v39  ;;  %v1468_v48 = vadd.f32 %v2912_v29, %v1467_v43 }
 0x1d1   :  { %v943_v49 = vpop.f32.mrf.mxu2 }
 0x1d2   :  { %v1751_v27 = vmax.f32 %v1468_v48, 0.0  ;;  %v944_v53 = vadd.f32 %v2621_v22, %v943_v49  ;;  %2365 = vmatmul.msk.bf16.gmra.mxu1 %vm1205_vm2, %v1149_v47  ;;  %v1430_v22 = vadd.f32 %v2912_v29, %v2840_v1  ;;  %v1433_v47 = vadd.f32 %v2912_v29, %v2847_v11  ;;  %v2471_v11 = vld [vmem:[%s3435_s0 + $0x1f0] sm:$0xff] }
 0x1d3   :  { %v786_v4 = vpop.f32.mrf.mxu0  ;;  %v3042_v8 = vpop.f32.mrf.mxu3 }
 0x1d4   :  { %v3044_v10 = vmax.f32 %v1735_v6, %v1751_v27  ;;  %v1106_v12 = vmax.f32 %v944_v53, 0.0  ;;  %v1736_v30 = vmax.f32 %v1430_v22, 0.0  ;;  %v787_v37 = vadd.f32 %v3055_v40, %v786_v4  ;;  %v2439_v22 = vld [vmem:[%s3435_s0 + $0xf0] sm:$0xff] }
 0x1d5   :  { %v1737_v4 = vmax.f32 %v1433_v47, 0.0 }
 0x1d6   :  { %v1181_v13 = vpack.c.bf16 %v1106_v12, %v1105_v9  ;;  %2306 = vmatmul.msk.bf16.gmra.mxu0 %vm475_vm1, %v2438_v59  ;;  %2338 = vmatmul.msk.bf16.gmra.mxu2 %vm475_vm1, %v2470_v51  ;;  %v1043_v48 = vmax.f32 %v787_v37, 0.0  ;;  %v1435_v37 = vadd.f32 %v2912_v29, %v2862_v28 }
 0x1d7   :  { %v1469_v15 = vpop.f32.mrf.mxu1 }
 0x1d8   :  { %v1470_v16 = vadd.f32 %v2912_v29, %v1469_v15  ;;  %2397 = vmatmul.msk.bf16.gmra.mxu3 %vm1205_vm2, %v1181_v13 }
 0x1d9   :  { %v946_v18 = vpop.f32.mrf.mxu2 }
 0x1da   :  { %v1752_v1 = vmax.f32 %v1470_v16, 0.0  ;;  %v947_v27 = vadd.f32 %v3055_v40, %v946_v18 }
 0x1db   :  { %v788_v39 = vpop.f32.mrf.mxu0  ;;  %v3058_v41 = vpop.f32.mrf.mxu3 }
 0x1dc   :  { %v3060_v43 = vmax.f32 %v1736_v30, %v1752_v1  ;;  %v789_v44 = vadd.f32 %v3055_v40, %v788_v39  ;;  %v1107_v16 = vmax.f32 %v947_v27, 0.0 }
 0x1de   :  { %v1044_v49 = vmax.f32 %v789_v44, 0.0 }
 0x1df   :  { %v1472_v6 = vpop.f32.mrf.mxu1 }
 0x1e0   :  { %v1150_v53 = vpack.c.bf16 %v1044_v49, %v1043_v48  ;;  %v1473_v59 = vadd.f32 %v2912_v29, %v1472_v6  ;;  %v1738_v48 = vmax.f32 %v1435_v37, 0.0 }
 0x1e1   :  { %v948_v51 = vpop.f32.mrf.mxu2 }
 0x1e2   :  { %v1753_v9 = vmax.f32 %v1473_v59, 0.0  ;;  %v949_v12 = vadd.f32 %v3055_v40, %v948_v51  ;;  %2366 = vmatmul.msk.bf16.gmra.mxu1 %vm1205_vm2, %v1150_v53  ;;  %v1438_v51 = vadd.f32 %v2912_v29, %v2869_v38  ;;  %v2472_v38 = vld [vmem:[%s3435_s0 + $0x1f8] sm:$0xff] }
 0x1e3   :  { %v791_v13 = vpop.f32.mrf.mxu0  ;;  %v3075_v15 = vpop.f32.mrf.mxu3 }
 0x1e4   :  { %v3077_v18 = vmax.f32 %v1737_v4, %v1753_v9  ;;  %v1108_v30 = vmax.f32 %v949_v12, 0.0  ;;  %v792_v49 = vadd.f32 %v3055_v40, %v791_v13 }
 0x1e6   :  { %v1182_v1 = vpack.c.bf16 %v1108_v30, %v1107_v16  ;;  %2307 = vmatmul.msk.bf16.gmra.mxu0 %vm475_vm1, %v2439_v22  ;;  %2339 = vmatmul.msk.bf16.gmra.mxu2 %vm475_vm1, %v2471_v11  ;;  %v1045_v4 = vmax.f32 %v792_v49, 0.0  ;;  %v1739_v30 = vmax.f32 %v1438_v51, 0.0 }
 0x1e7   :  { %v1474_v39 = vpop.f32.mrf.mxu1 }
 0x1e8   :  { %v1475_v44 = vadd.f32 %v2912_v29, %v1474_v39  ;;  %2398 = vmatmul.msk.bf16.gmra.mxu3 %vm1205_vm2, %v1182_v1  ;;  %v2440_v39 = vld [vmem:[%s3435_s0 + $0xf8] sm:$0xff] }
 0x1e9   :  { %v951_v47 = vpop.f32.mrf.mxu2 }
 0x1ea   :  { %v1754_v6 = vmax.f32 %v1475_v44, 0.0  ;;  %v952_v22 = vadd.f32 %v3055_v40, %v951_v47 }
 0x1eb   :  { %v793_v27 = vpop.f32.mrf.mxu0  ;;  %v3086_v53 = vpop.f32.mrf.mxu3 }
 0x1ec   :  { %3447 = vst [vmem:[#allocation11_spill] sm:$0xff] %v3086_v53  ;;  %v3088_v59 = vmax.f32 %v1738_v48, %v1754_v6  ;;  %v794_v28 = vadd.f32 %v3055_v40, %v793_v27  ;;  %v1109_v48 = vmax.f32 %v952_v22, 0.0  ;;  %v1440_v27 = vadd.f32 %v2912_v29, %v2884_v56 }
 0x1ee   :  { %v1046_v9 = vmax.f32 %v794_v28, 0.0 }
 0x1ef   :  { %v1477_v12 = vpop.f32.mrf.mxu1 }
 0x1f0   :  { %v1151_v11 = vpack.c.bf16 %v1046_v9, %v1045_v4  ;;  %v1478_v16 = vadd.f32 %v2912_v29, %v1477_v12  ;;  %v1740_v12 = vmax.f32 %v1440_v27, 0.0 }
 0x1f1   :  { %v953_v13 = vpop.f32.mrf.mxu2 }
 0x1f2   :  { %v1755_v37 = vmax.f32 %v1478_v16, 0.0  ;;  %v954_v1 = vadd.f32 %v3055_v40, %v953_v13  ;;  %2367 = vmatmul.msk.bf16.gmra.mxu1 %vm1205_vm2, %v1151_v11 }
 0x1f3   :  { %v796_v44 = vpop.f32.mrf.mxu0  ;;  %v3103_v47 = vpop.f32.mrf.mxu3 }
 0x1f4   :  { %3448 = vst [vmem:[#allocation12_spill] sm:$0xff] %v3103_v47  ;;  %v3105_v49 = vmax.f32 %v1739_v30, %v1755_v37  ;;  %v1110_v6 = vmax.f32 %v954_v1, 0.0  ;;  %v797_v22 = vadd.f32 %v3055_v40, %v796_v44  ;;  %v1443_v37 = vadd.f32 %v2912_v29, %v2891_v5 }
 0x1f6   :  { %v1183_v28 = vpack.c.bf16 %v1110_v6, %v1109_v48  ;;  %2308 = vmatmul.msk.bf16.gmra.mxu0 %vm475_vm1, %v2440_v39  ;;  %2340 = vmatmul.msk.bf16.gmra.mxu2 %vm475_vm1, %v2472_v38  ;;  %v1047_v1 = vmax.f32 %v797_v22, 0.0 }
 0x1f7   :  { %v1479_v51 = vpop.f32.mrf.mxu1 }
 0x1f8   :  { %v1480_v4 = vadd.f32 %v2912_v29, %v1479_v51  ;;  %2399 = vmatmul.msk.bf16.gmra.mxu3 %vm1205_vm2, %v1183_v28  ;;  %v1741_v28 = vmax.f32 %v1443_v37, 0.0 }
 0x1f9   :  { %v956_v9 = vpop.f32.mrf.mxu2 }
 0x1fa   :  { %v1756_v11 = vmax.f32 %v1480_v4, 0.0  ;;  %v957_v48 = vadd.f32 %v3055_v40, %v956_v9  ;;  %v1445_v9 = vadd.f32 %v2912_v29, %v2906_v25 }
 0x1fb   :  { %v798_v16 = vpop.f32.mrf.mxu0  ;;  %v3114_v13 = vpop.f32.mrf.mxu3 }
 0x1fc   :  { %3449 = vst [vmem:[#allocation13_spill] sm:$0xff] %v3114_v13  ;;  %v3116_v30 = vmax.f32 %v1740_v12, %v1756_v11  ;;  %v799_v56 = vadd.f32 %v3055_v40, %v798_v16  ;;  %v1111_v16 = vmax.f32 %v957_v48, 0.0 }
 0x1fe   :  { %v1048_v39 = vmax.f32 %v799_v56, 0.0 }
 0x1ff   :  { %v1482_v38 = vpop.f32.mrf.mxu1 }
 0x200   :  { %v1152_v6 = vpack.c.bf16 %v1048_v39, %v1047_v1  ;;  %v1483_v27 = vadd.f32 %v2912_v29, %v1482_v38  ;;  %v1742_v38 = vmax.f32 %v1445_v9, 0.0 }
 0x201   :  { %v958_v44 = vpop.f32.mrf.mxu2 }
 0x202   :  { %v1757_v51 = vmax.f32 %v1483_v27, 0.0  ;;  %v959_v4 = vadd.f32 %v3055_v40, %v958_v44  ;;  %2368 = vmatmul.msk.bf16.gmra.mxu1 %vm1205_vm2, %v1152_v6 }
 0x203   :  { %v801_v12 = vpop.f32.mrf.mxu0  ;;  %v3125_v11 = vpop.f32.mrf.mxu3 }
 0x204   :  { %3450 = vst [vmem:[#allocation14_spill] sm:$0xff] %v3125_v11  ;;  %v3127_v5 = vmax.f32 %v1741_v28, %v1757_v51  ;;  %v1112_v22 = vmax.f32 %v959_v4, 0.0  ;;  %v802_v6 = vadd.f32 %v3055_v40, %v801_v12 }
 0x206   :  { %v1184_v56 = vpack.c.bf16 %v1112_v22, %v1111_v16  ;;  %v1049_v51 = vmax.f32 %v802_v6, 0.0 }
 0x207   :  { %v1484_v1 = vpop.f32.mrf.mxu1 }
 0x208   :  { %v1485_v39 = vadd.f32 %v2912_v29, %v1484_v1  ;;  %2400 = vmatmul.msk.bf16.gmra.mxu3 %vm1205_vm2, %v1184_v56 }
 0x209   :  { %v961_v37 = vpop.f32.mrf.mxu2 }
 0x20a   :  { %v1758_v27 = vmax.f32 %v1485_v39, 0.0  ;;  %v962_v16 = vadd.f32 %v3055_v40, %v961_v37 }
 0x20b   :  { %v803_v44 = vpop.f32.mrf.mxu0  ;;  %v3134_v61 = vpop.f32.mrf.mxu3 }
 0x20c   :  { %3451 = vst [vmem:[#allocation15_spill] sm:$0xff] %v3134_v61  ;;  %v3136_v48 = vmax.f32 %v1742_v38, %v1758_v27  ;;  %v804_v28 = vadd.f32 %v3055_v40, %v803_v44  ;;  %v1113_v38 = vmax.f32 %v962_v16, 0.0 }
 0x20e   :  { %v1050_v25 = vmax.f32 %v804_v28, 0.0 }
 0x20f   :  { %v1487_v4 = vpop.f32.mrf.mxu1 }
 0x210   :  { %v1153_v22 = vpack.c.bf16 %v1050_v25, %v1049_v51  ;;  %v1488_v56 = vadd.f32 %v2912_v29, %v1487_v4 }
 0x211   :  { %v963_v1 = vpop.f32.mrf.mxu2 }
 0x212   :  { %v1759_v9 = vmax.f32 %v1488_v56, 0.0  ;;  %v964_v12 = vadd.f32 %v3055_v40, %v963_v1  ;;  %2369 = vmatmul.msk.bf16.gmra.mxu1 %vm1205_vm2, %v1153_v22 }
 0x213   :  { %v806_v39 = vpop.f32.mrf.mxu0  ;;  %v3143_v61 = vpop.f32.mrf.mxu3 }
 0x214   :  { %3452 = vst [vmem:[#allocation16_spill] sm:$0xff] %v3143_v61  ;;  %v3146_v27 = vmax.f32 %v2932_v3, %v1759_v9  ;;  %v1114_v6 = vmax.f32 %v964_v12, 0.0  ;;  %v807_v25 = vadd.f32 %v3055_v40, %v806_v39 }
 0x216   :  { %v1185_v44 = vpack.c.bf16 %v1114_v6, %v1113_v38  ;;  %v1051_v16 = vmax.f32 %v807_v25, 0.0 }
 0x217   :  { %v1489_v28 = vpop.f32.mrf.mxu1 }
 0x218   :  { %v1490_v37 = vadd.f32 %v2912_v29, %v1489_v28  ;;  %2401 = vmatmul.msk.bf16.gmra.mxu3 %vm1205_vm2, %v1185_v44 }
 0x219   :  { %v966_v51 = vpop.f32.mrf.mxu2 }
 0x21a   :  { %v1760_v4 = vmax.f32 %v1490_v37, 0.0  ;;  %v967_v38 = vadd.f32 %v3055_v40, %v966_v51 }
 0x21b   :  { %v808_v56 = vpop.f32.mrf.mxu0  ;;  %v3151_v22 = vpop.f32.mrf.mxu3 }
 0x21c   :  { %v3154_v1 = vmax.f32 %v2943_v26, %v1760_v4  ;;  %v809_v3 = vadd.f32 %v3055_v40, %v808_v56  ;;  %v1115_v26 = vmax.f32 %v967_v38, 0.0 }
 0x21e   :  { %v1052_v9 = vmax.f32 %v809_v3, 0.0 }
 0x21f   :  { %v1492_v12 = vpop.f32.mrf.mxu1 }
 0x220   :  { %v1154_v6 = vpack.c.bf16 %v1052_v9, %v1051_v16  ;;  %v1493_v44 = vadd.f32 %v2912_v29, %v1492_v12 }
 0x221   :  { %v968_v28 = vpop.f32.mrf.mxu2 }
 0x222   :  { %v1761_v61 = vmax.f32 %v1493_v44, 0.0  ;;  %v969_v39 = vadd.f32 %v3055_v40, %v968_v28  ;;  %2370 = vmatmul.msk.bf16.gmra.mxu1 %vm1205_vm2, %v1154_v6 }
 0x223   :  { %v811_v37 = vpop.f32.mrf.mxu0  ;;  %v3161_v34 = vpop.f32.mrf.mxu3 }
 0x224   :  { %v3164_v4 = vmax.f32 %v2960_v31, %v1761_v61  ;;  %v1116_v25 = vmax.f32 %v969_v39, 0.0  ;;  %v812_v9 = vadd.f32 %v3055_v40, %v811_v37 }
 0x226   :  { %v1186_v56 = vpack.c.bf16 %v1116_v25, %v1115_v26  ;;  %v1053_v31 = vmax.f32 %v812_v9, 0.0 }
 0x227   :  { %v1494_v3 = vpop.f32.mrf.mxu1 }
 0x228   :  { %v1495_v51 = vadd.f32 %v2912_v29, %v1494_v3  ;;  %2402 = vmatmul.msk.bf16.gmra.mxu3 %vm1205_vm2, %v1186_v56 }
 0x229   :  { %v971_v16 = vpop.f32.mrf.mxu2 }
 0x22a   :  { %v1762_v12 = vmax.f32 %v1495_v51, 0.0  ;;  %v972_v26 = vadd.f32 %v3055_v40, %v971_v16 }
 0x22b   :  { %v813_v44 = vpop.f32.mrf.mxu0  ;;  %v3169_v6 = vpop.f32.mrf.mxu3 }
 0x22c   :  { %v3172_v28 = vmax.f32 %v2971_v20, %v1762_v12  ;;  %v814_v61 = vadd.f32 %v3055_v40, %v813_v44  ;;  %v1117_v20 = vmax.f32 %v972_v26, 0.0 }
 0x22e   :  { %v1054_v38 = vmax.f32 %v814_v61, 0.0 }
 0x22f   :  { %v1497_v39 = vpop.f32.mrf.mxu1 }
 0x230   :  { %v1155_v25 = vpack.c.bf16 %v1054_v38, %v1053_v31  ;;  %v1498_v56 = vadd.f32 %v2912_v29, %v1497_v39 }
 0x231   :  { %v973_v3 = vpop.f32.mrf.mxu2 }
 0x232   :  { %v1763_v11 = vmax.f32 %v1498_v56, 0.0  ;;  %v974_v37 = vadd.f32 %v3055_v40, %v973_v3  ;;  %2371 = vmatmul.msk.bf16.gmra.mxu1 %vm1205_vm2, %v1155_v25 }
 0x233   :  { %v816_v51 = vpop.f32.mrf.mxu0  ;;  %v3179_v17 = vpop.f32.mrf.mxu3 }
 0x234   :  { %v3182_v12 = vmax.f32 %v2988_v57, %v1763_v11  ;;  %v1118_v9 = vmax.f32 %v974_v37, 0.0  ;;  %v817_v38 = vadd.f32 %v3055_v40, %v816_v51 }
 0x236   :  { %v1187_v44 = vpack.c.bf16 %v1118_v9, %v1117_v20  ;;  %v1055_v11 = vmax.f32 %v817_v38, 0.0 }
 0x237   :  { %v1499_v61 = vpop.f32.mrf.mxu1 }
 0x238   :  { %v1500_v16 = vadd.f32 %v2912_v29, %v1499_v61  ;;  %2403 = vmatmul.msk.bf16.gmra.mxu3 %vm1205_vm2, %v1187_v44 }
 0x239   :  { %v976_v31 = vpop.f32.mrf.mxu2 }
 0x23a   :  { %v1764_v39 = vmax.f32 %v1500_v16, 0.0  ;;  %v977_v20 = vadd.f32 %v3055_v40, %v976_v31 }
 0x23b   :  { %v818_v56 = vpop.f32.mrf.mxu0  ;;  %v3187_v25 = vpop.f32.mrf.mxu3 }
 0x23c   :  { %v3190_v3 = vmax.f32 %v2999_v42, %v1764_v39  ;;  %v819_v57 = vadd.f32 %v3055_v40, %v818_v56  ;;  %v1119_v42 = vmax.f32 %v977_v20, 0.0 }
 0x23e   :  { %v1056_v26 = vmax.f32 %v819_v57, 0.0 }
 0x23f   :  { %v1502_v37 = vpop.f32.mrf.mxu1 }
 0x240   :  { %v1156_v9 = vpack.c.bf16 %v1056_v26, %v1055_v11  ;;  %v1503_v44 = vadd.f32 %v2912_v29, %v1502_v37 }
 0x241   :  { %v978_v61 = vpop.f32.mrf.mxu2 }
 0x242   :  { %v1765_v13 = vmax.f32 %v1503_v44, 0.0  ;;  %v979_v51 = vadd.f32 %v3055_v40, %v978_v61  ;;  %2372 = vmatmul.msk.bf16.gmra.mxu1 %vm1205_vm2, %v1156_v9 }
 0x243   :  { %v821_v16 = vpop.f32.mrf.mxu0  ;;  %v3197_v63 = vpop.f32.mrf.mxu3 }
 0x244   :  { %v3200_v39 = vmax.f32 %v3016_v0, %v1765_v13  ;;  %v1120_v38 = vmax.f32 %v979_v51, 0.0  ;;  %v822_v26 = vadd.f32 %v3055_v40, %v821_v16 }
 0x246   :  { %v1188_v56 = vpack.c.bf16 %v1120_v38, %v1119_v42  ;;  %v1057_v13 = vmax.f32 %v822_v26, 0.0 }
 0x247   :  { %v1504_v57 = vpop.f32.mrf.mxu1 }
 0x248   :  { %v1505_v31 = vadd.f32 %v2912_v29, %v1504_v57  ;;  %2404 = vmatmul.msk.bf16.gmra.mxu3 %vm1205_vm2, %v1188_v56 }
 0x249   :  { %v981_v11 = vpop.f32.mrf.mxu2 }
 0x24a   :  { %v1766_v37 = vmax.f32 %v1505_v31, 0.0  ;;  %v982_v42 = vadd.f32 %v3055_v40, %v981_v11 }
 0x24b   :  { %v823_v44 = vpop.f32.mrf.mxu0  ;;  %v3205_v9 = vpop.f32.mrf.mxu3 }
 0x24c   :  { %v3208_v61 = vmax.f32 %v3027_v35, %v1766_v37  ;;  %v824_v0 = vadd.f32 %v3055_v40, %v823_v44  ;;  %v1121_v35 = vmax.f32 %v982_v42, 0.0 }
 0x24e   :  { %v1058_v20 = vmax.f32 %v824_v0, 0.0 }
 0x24f   :  { %v1507_v51 = vpop.f32.mrf.mxu1 }
 0x250   :  { %v1157_v38 = vpack.c.bf16 %v1058_v20, %v1057_v13  ;;  %v1508_v56 = vadd.f32 %v2912_v29, %v1507_v51 }
 0x251   :  { %v983_v57 = vpop.f32.mrf.mxu2 }
 0x252   :  { %v1767_v47 = vmax.f32 %v1508_v56, 0.0  ;;  %v984_v16 = vadd.f32 %v3055_v40, %v983_v57  ;;  %2373 = vmatmul.msk.bf16.gmra.mxu1 %vm1205_vm2, %v1157_v38 }
 0x253   :  { %v826_v31 = vpop.f32.mrf.mxu0  ;;  %v3215_v52 = vpop.f32.mrf.mxu3 }
 0x254   :  { %v3218_v37 = vmax.f32 %v3044_v10, %v1767_v47  ;;  %v1122_v26 = vmax.f32 %v984_v16, 0.0  ;;  %v827_v20 = vadd.f32 %v3055_v40, %v826_v31 }
 0x256   :  { %v1189_v44 = vpack.c.bf16 %v1122_v26, %v1121_v35  ;;  %v1059_v47 = vmax.f32 %v827_v20, 0.0 }
 0x257   :  { %v1509_v0 = vpop.f32.mrf.mxu1 }
 0x258   :  { %v1510_v11 = vadd.f32 %v2912_v29, %v1509_v0  ;;  %2405 = vmatmul.msk.bf16.gmra.mxu3 %vm1205_vm2, %v1189_v44 }
 0x259   :  { %v986_v13 = vpop.f32.mrf.mxu2 }
 0x25a   :  { %v1768_v51 = vmax.f32 %v1510_v11, 0.0  ;;  %v987_v35 = vadd.f32 %v3055_v40, %v986_v13 }
 0x25b   :  { %v828_v56 = vpop.f32.mrf.mxu0  ;;  %v3223_v38 = vpop.f32.mrf.mxu3 }
 0x25c   :  { %v3226_v57 = vmax.f32 %v3060_v43, %v1768_v51  ;;  %v829_v10 = vadd.f32 %v3055_v40, %v828_v56  ;;  %v1123_v43 = vmax.f32 %v987_v35, 0.0 }
 0x25e   :  { %v1060_v42 = vmax.f32 %v829_v10, 0.0 }
 0x25f   :  { %v1512_v16 = vpop.f32.mrf.mxu1 }
 0x260   :  { %v1158_v26 = vpack.c.bf16 %v1060_v42, %v1059_v47  ;;  %v1513_v44 = vadd.f32 %v2912_v29, %v1512_v16 }
 0x261   :  { %v988_v0 = vpop.f32.mrf.mxu2 }
 0x262   :  { %v1769_v53 = vmax.f32 %v1513_v44, 0.0  ;;  %v989_v31 = vadd.f32 %v3055_v40, %v988_v0  ;;  %2374 = vmatmul.msk.bf16.gmra.mxu1 %vm1205_vm2, %v1158_v26 }
 0x263   :  { %v831_v11 = vpop.f32.mrf.mxu0  ;;  %v3233_v33 = vpop.f32.mrf.mxu3 }
 0x264   :  { %v3236_v51 = vmax.f32 %v3077_v18, %v1769_v53  ;;  %v1124_v20 = vmax.f32 %v989_v31, 0.0  ;;  %v832_v42 = vadd.f32 %v3055_v40, %v831_v11 }
 0x266   :  { %3453 = vst [vmem:[#allocation17_spill] sm:$0xff] %v3236_v51  ;;  %v1190_v56 = vpack.c.bf16 %v1124_v20, %v1123_v43  ;;  %v1061_v53 = vmax.f32 %v832_v42, 0.0 }
 0x267   :  { %v1514_v10 = vpop.f32.mrf.mxu1 }
 0x268   :  { %v1515_v13 = vadd.f32 %v2912_v29, %v1514_v10  ;;  %2406 = vmatmul.msk.bf16.gmra.mxu3 %vm1205_vm2, %v1190_v56 }
 0x269   :  { %v991_v47 = vpop.f32.mrf.mxu2 }
 0x26a   :  { %v1770_v16 = vmax.f32 %v1515_v13, 0.0  ;;  %v992_v43 = vadd.f32 %v3055_v40, %v991_v47 }
 0x26b   :  { %v833_v44 = vpop.f32.mrf.mxu0  ;;  %v3241_v26 = vpop.f32.mrf.mxu3 }
 0x26c   :  { %3454 = vst [vmem:[#allocation18_spill] sm:$0xff] %v3241_v26  ;;  %v3244_v0 = vmax.f32 %v3088_v59, %v1770_v16  ;;  %v834_v18 = vadd.f32 %v3055_v40, %v833_v44  ;;  %v1125_v59 = vmax.f32 %v992_v43, 0.0 }
 0x26e   :  { %v1062_v35 = vmax.f32 %v834_v18, 0.0 }
 0x26f   :  { %v1517_v31 = vpop.f32.mrf.mxu1 }
 0x270   :  { %v1159_v20 = vpack.c.bf16 %v1062_v35, %v1061_v53  ;;  %v1518_v56 = vadd.f32 %v2912_v29, %v1517_v31 }
 0x271   :  { %v993_v10 = vpop.f32.mrf.mxu2 }
 0x272   :  { %v1771_v51 = vmax.f32 %v1518_v56, 0.0  ;;  %v994_v11 = vadd.f32 %v3055_v40, %v993_v10  ;;  %2375 = vmatmul.msk.bf16.gmra.mxu1 %vm1205_vm2, %v1159_v20 }
 0x273   :  { %v836_v13 = vpop.f32.mrf.mxu0  ;;  %v3251_v26 = vpop.f32.mrf.mxu3 }
 0x274   :  { %v3254_v16 = vmax.f32 %v3105_v49, %v1771_v51  ;;  %v1126_v42 = vmax.f32 %v994_v11, 0.0  ;;  %v837_v35 = vadd.f32 %v3055_v40, %v836_v13 }
 0x276   :  { %3455 = vst [vmem:[#allocation19_spill] sm:$0xff] %v3254_v16  ;;  %v1191_v44 = vpack.c.bf16 %v1126_v42, %v1125_v59  ;;  %v1063_v51 = vmax.f32 %v837_v35, 0.0 }
 0x277   :  { %v1519_v18 = vpop.f32.mrf.mxu1 }
 0x278   :  { %v1520_v47 = vadd.f32 %v2912_v29, %v1519_v18  ;;  %2407 = vmatmul.msk.bf16.gmra.mxu3 %vm1205_vm2, %v1191_v44 }
 0x279   :  { %v996_v53 = vpop.f32.mrf.mxu2 }
 0x27a   :  { %v1772_v31 = vmax.f32 %v1520_v47, 0.0  ;;  %v997_v59 = vadd.f32 %v3055_v40, %v996_v53 }
 0x27b   :  { %v838_v56 = vpop.f32.mrf.mxu0  ;;  %v3259_v20 = vpop.f32.mrf.mxu3 }
 0x27c   :  { %v3262_v10 = vmax.f32 %v3116_v30, %v1772_v31  ;;  %v839_v49 = vadd.f32 %v3055_v40, %v838_v56  ;;  %v1127_v30 = vmax.f32 %v997_v59, 0.0  ;;  %v1568_v59 = vadd.f32 %v2912_v29, %v2756_v46 }
 0x27d   :  { %v1570_v46 = vadd.f32 %v2912_v29, %v2770_v58 }
 0x27e   :  { %v1064_v43 = vmax.f32 %v839_v49, 0.0 }
 0x27f   :  { %v1522_v11 = vpop.f32.mrf.mxu1 }
 0x280   :  { %v1160_v42 = vpack.c.bf16 %v1064_v43, %v1063_v51  ;;  %v1523_v44 = vadd.f32 %v2912_v29, %v1522_v11 }
 0x281   :  { %v998_v18 = vpop.f32.mrf.mxu2 }
 0x282   :  { %v1773_v16 = vmax.f32 %v1523_v44, 0.0  ;;  %v999_v13 = vadd.f32 %v3055_v40, %v998_v18  ;;  %2376 = vmatmul.msk.bf16.gmra.mxu1 %vm1205_vm2, %v1160_v42  ;;  %v1791_v18 = vmax.f32 %v1568_v59, 0.0 }
 0x283   :  { %v3269_v47 = vpop.f32.mrf.mxu3 }
 0x284   :  { %v3272_v31 = vmax.f32 %v3127_v5, %v1773_v16  ;;  %v1128_v35 = vmax.f32 %v999_v13, 0.0  ;;  %v1608_v16 = vadd.f32 %v2912_v29, %v2941_v24  ;;  %v1648_v13 = vadd.f32 %v2912_v29, %v3151_v22 }
 0x285   :  { %v1610_v24 = vadd.f32 %v2912_v29, %v2958_v55 }
 0x286   :  { %v1192_v56 = vpack.c.bf16 %v1128_v35, %v1127_v30 }
 0x287   :  { %v1524_v49 = vpop.f32.mrf.mxu1 }
 0x288   :  { %v1525_v53 = vadd.f32 %v2912_v29, %v1524_v49  ;;  %2408 = vmatmul.msk.bf16.gmra.mxu3 %vm1205_vm2, %v1192_v56  ;;  %v1823_v49 = vmax.f32 %v1648_v13, 0.0  ;;  %v1573_v13 = vadd.f32 %v2912_v29, %v2778_v2 }
 0x28a   :  { %v1774_v51 = vmax.f32 %v1525_v53, 0.0 }
 0x28b   :  { %v3276_v43 = vpop.f32.mrf.mxu3 }
 0x28c   :  { %v3279_v40 = vmax.f32 %v3136_v48, %v1774_v51  ;;  %v1807_v48 = vmax.f32 %v1608_v16, 0.0 }
 0x28e   :  { %3456 = vst [vmem:[#allocation20_spill] sm:$0xff] %v3279_v40  ;;  %v1792_v40 = vmax.f32 %v1570_v46, 0.0  ;;  %v1613_v46 = vadd.f32 %v2912_v29, %v2969_v19 }
 0x28f   :  { %v1527_v11 = vpop.f32.mrf.mxu1 }
 0x290   :  { %v1528_v5 = vadd.f32 %v2912_v29, %v1527_v11 }
 0x292   :  { %v1775_v42 = vmax.f32 %v1528_v5, 0.0 }
 0x293   :  { %v3286_v44 = vpop.f32.mrf.mxu3 }
 0x294   :  { %v1887_v30 = vmax.f32 %v3146_v27, %v1775_v42  ;;  %v1650_v27 = vadd.f32 %v2912_v29, %v3161_v34  ;;  %v1808_v42 = vmax.f32 %v1610_v24, 0.0 }
 0x296   :  { %v1903_v35 = vmax.f32 %v1887_v30, %v1791_v18 }
 0x297   :  { %v1529_v56 = vpop.f32.mrf.mxu1 }
 0x298   :  { %v1530_v53 = vadd.f32 %v2912_v29, %v1529_v56  ;;  %v1919_v51 = vmax.f32 %v1903_v35, %v1807_v48  ;;  %v1824_v48 = vmax.f32 %v1650_v27, 0.0 }
 0x29a   :  { %v1776_v11 = vmax.f32 %v1530_v53, 0.0  ;;  %v1935_v59 = vmax.f32 %v1919_v51, %v1823_v49  ;;  %v1793_v53 = vmax.f32 %v1573_v13, 0.0 }
 0x29b   :  { %v1687_v5 = vpop.f32.mrf.mxu3 }
 0x29c   :  { %v1888_v22 = vmax.f32 %v3154_v1, %v1776_v11  ;;  %v1688_v16 = vadd.f32 %v2912_v29, %v1687_v5  ;;  %v1809_v11 = vmax.f32 %v1613_v46, 0.0 }
 0x29e   :  { %v1904_v58 = vmax.f32 %v1888_v22, %v1792_v40  ;;  %v1839_v18 = vmax.f32 %v1688_v16, 0.0  ;;  %v3308_v40 = vld [vmem:[%s3439_s4] ss:$0 sm:$0xff]  ;;  %s2509_s4 = smov [#allocation2]  }
 0x29f   :  { %v1532_v30 = vpop.f32.mrf.mxu1  ;;  %v1653_v2 = vadd.f32 %v3308_v40, %v3169_v6  ;;  %v1575_v19 = vadd.f32 %v3308_v40, %v2792_v14  ;;  %v1578_v46 = vadd.f32 %v3308_v40, %v2800_v23  ;;  %s2007_s22 = sshll.u32 %s2509_s4, 4  ;;  %s2008_s22 = int_to_ptr.vmem [resolvable:$true] %s2007_s22 }
 0x2a0   :  { %v1533_v55 = vadd.f32 %v2912_v29, %v1532_v30  ;;  %v1951_v35 = vmax.f32 %v1935_v59, %v1839_v18  ;;  %v1920_v56 = vmax.f32 %v1904_v58, %v1808_v42  ;;  %v1615_v58 = vadd.f32 %v3308_v40, %v2986_v50 }
 0x2a1   :  { %v1825_v27 = vmax.f32 %v1653_v2, 0.0  ;;  %v1794_v13 = vmax.f32 %v1575_v19, 0.0  ;;  %v1655_v30 = vadd.f32 %v3308_v40, %v3179_v17  ;;  %v1618_v2 = vadd.f32 %v3308_v40, %v2997_v62 }
 0x2a2   :  { %v1777_v34 = vmax.f32 %v1533_v55, 0.0  ;;  %1967 = vxpose.xlu0.b32.start [1/16] (narrow) %v1951_v35, 32  ;;  %v1936_v1 = vmax.f32 %v1920_v56, %v1824_v48  ;;  %v1810_v55 = vmax.f32 %v1615_v58, 0.0 }
 0x2a3   :  { %v1689_v49 = vpop.f32.mrf.mxu3  ;;  %v1826_v50 = vmax.f32 %v1655_v30, 0.0 }
 0x2a4   :  { %v1889_v51 = vmax.f32 %v3164_v4, %v1777_v34  ;;  %v1690_v24 = vadd.f32 %v3308_v40, %v1689_v49 }
 0x2a6   :  { %v1905_v59 = vmax.f32 %v1889_v51, %v1793_v53  ;;  %v1840_v29 = vmax.f32 %v1690_v24, 0.0  ;;  %v1795_v24 = vmax.f32 %v1578_v46, 0.0 }
 0x2a7   :  { %v1534_v5 = vpop.f32.mrf.mxu1 }
 0x2a8   :  { %v1535_v22 = vadd.f32 %v3308_v40, %v1534_v5  ;;  %v1952_v16 = vmax.f32 %v1936_v1, %v1840_v29  ;;  %v1921_v42 = vmax.f32 %v1905_v59, %v1809_v11  ;;  %v1658_v11 = vadd.f32 %v3308_v40, %v3187_v25 }
 0x2a9   :  { %v1811_v29 = vmax.f32 %v1618_v2, 0.0  ;;  %v1663_v2 = vadd.f32 %v3308_v40, %v3205_v9 }
 0x2aa   :  { %v1778_v6 = vmax.f32 %v1535_v22, 0.0  ;;  %1968 = vxpose.xlu0.b32.cont [2/16] (narrow) %v1952_v16, 32  ;;  %v1937_v4 = vmax.f32 %v1921_v42, %v1825_v27  ;;  %v1580_v27 = vadd.f32 %v3308_v40, %v2814_v36  ;;  %v1827_v62 = vmax.f32 %v1658_v11, 0.0 }
 0x2ab   :  { %v1692_v18 = vpop.f32.mrf.mxu3  ;;  %v1585_v11 = vadd.f32 %v3308_v40, %v2836_v60 }
 0x2ac   :  { %v1890_v48 = vmax.f32 %v3172_v28, %v1778_v6  ;;  %v1693_v14 = vadd.f32 %v3308_v40, %v1692_v18  ;;  %v1620_v6 = vadd.f32 %v3308_v40, %v3014_v54  ;;  %v1796_v18 = vmax.f32 %v1580_v27, 0.0 }
 0x2ae   :  { %v1906_v35 = vmax.f32 %v1890_v48, %v1794_v13  ;;  %v1841_v56 = vmax.f32 %v1693_v14, 0.0  ;;  %v1660_v13 = vadd.f32 %v3308_v40, %v3197_v63  ;;  %v1812_v48 = vmax.f32 %v1620_v6, 0.0 }
 0x2af   :  { %v1537_v34 = vpop.f32.mrf.mxu1 }
 0x2b0   :  { %v1538_v1 = vadd.f32 %v3308_v40, %v1537_v34  ;;  %v1953_v49 = vmax.f32 %v1937_v4, %v1841_v56  ;;  %v1922_v53 = vmax.f32 %v1906_v35, %v1810_v55  ;;  %v1583_v35 = vadd.f32 %v3308_v40, %v2822_v45 }
 0x2b1   :  { %v1828_v54 = vmax.f32 %v1660_v13, 0.0 }
 0x2b2   :  { %v1779_v17 = vmax.f32 %v1538_v1, 0.0  ;;  %1969 = vxpose.xlu0.b32.cont [3/16] (narrow) %v1953_v49, 32  ;;  %v1938_v28 = vmax.f32 %v1922_v53, %v1826_v50  ;;  %v1623_v1 = vadd.f32 %v3308_v40, %v3025_v32  ;;  %v1797_v53 = vmax.f32 %v1583_v35, 0.0 }
 0x2b3   :  { %v1694_v51 = vpop.f32.mrf.mxu3  ;;  %v1829_v32 = vmax.f32 %v1663_v2, 0.0  ;;  %v1670_v2 = vadd.f32 %v3308_v40, %v3233_v33 }
 0x2b4   :  { %v1891_v59 = vmax.f32 %v3182_v12, %v1779_v17  ;;  %v1695_v23 = vadd.f32 %v3308_v40, %v1694_v51 }
 0x2b6   :  { %v1907_v19 = vmax.f32 %v1891_v59, %v1795_v24  ;;  %v1842_v5 = vmax.f32 %v1695_v23, 0.0 }
 0x2b7   :  { %v1539_v22 = vpop.f32.mrf.mxu1 }
 0x2b8   :  { %v1540_v16 = vadd.f32 %v3308_v40, %v1539_v22  ;;  %v1954_v42 = vmax.f32 %v1938_v28, %v1842_v5  ;;  %v1923_v58 = vmax.f32 %v1907_v19, %v1811_v29  ;;  %v1813_v28 = vmax.f32 %v1623_v1, 0.0 }
 0x2b9   :  { %v1625_v5 = vadd.f32 %v3308_v40, %v3042_v8  ;;  %v1798_v22 = vmax.f32 %v1585_v11, 0.0 }
 0x2ba   :  { %v1780_v25 = vmax.f32 %v1540_v16, 0.0  ;;  %1970 = vxpose.xlu0.b32.cont [4/16] (narrow) %v1954_v42, 32  ;;  %v1939_v12 = vmax.f32 %v1923_v58, %v1827_v62  ;;  %v1665_v62 = vadd.f32 %v3308_v40, %v3215_v52 }
 0x2bb   :  { %v1697_v4 = vpop.f32.mrf.mxu3  ;;  %v1814_v42 = vmax.f32 %v1625_v5, 0.0 }
 0x2bc   :  { %v1892_v30 = vmax.f32 %v3190_v3, %v1780_v25  ;;  %v1698_v36 = vadd.f32 %v3308_v40, %v1697_v4  ;;  %v1588_v25 = vadd.f32 %v3308_v40, %v2844_v7  ;;  %v1830_v8 = vmax.f32 %v1665_v62, 0.0  ;;  %v3460_v62 = vld [vmem:[#allocation17_spill] sm:$0xff] }
 0x2be   :  { %v1908_v14 = vmax.f32 %v1892_v30, %v1796_v18  ;;  %v1843_v55 = vmax.f32 %v1698_v36, 0.0  ;;  %v1628_v30 = vadd.f32 %v3308_v40, %v3058_v41 }
 0x2bf   :  { %v1542_v56 = vpop.f32.mrf.mxu1 }
 0x2c0   :  { %v1543_v46 = vadd.f32 %v3308_v40, %v1542_v56  ;;  %v1955_v34 = vmax.f32 %v1939_v12, %v1843_v55  ;;  %v1924_v50 = vmax.f32 %v1908_v14, %v1812_v48  ;;  %v1799_v48 = vmax.f32 %v1588_v25, 0.0  ;;  %v3461_v25 = vld [vmem:[#allocation6_spill] sm:$0xff] }
 0x2c1   :  { %v1668_v14 = vadd.f32 %v3308_v40, %v3223_v38  ;;  %v1815_v35 = vmax.f32 %v1628_v30, 0.0 }
 0x2c2   :  { %v1781_v63 = vmax.f32 %v1543_v46, 0.0  ;;  %1971 = vxpose.xlu0.b32.cont [5/16] (narrow) %v1955_v34, 32  ;;  %v1940_v3 = vmax.f32 %v1924_v50, %v1828_v54  ;;  %v1590_v46 = vadd.f32 %v3308_v40, %v2858_v21 }
 0x2c3   :  { %v1699_v49 = vpop.f32.mrf.mxu3  ;;  %v1831_v41 = vmax.f32 %v1668_v14, 0.0 }
 0x2c4   :  { %v1893_v17 = vmax.f32 %v3200_v39, %v1781_v63  ;;  %v1700_v45 = vadd.f32 %v3308_v40, %v1699_v49 }
 0x2c6   :  { %v1909_v51 = vmax.f32 %v1893_v17, %v1797_v53  ;;  %v1844_v24 = vmax.f32 %v1700_v45, 0.0  ;;  %v1800_v53 = vmax.f32 %v1590_v46, 0.0 }
 0x2c7   :  { %v1544_v59 = vpop.f32.mrf.mxu1 }
 0x2c8   :  { %v1545_v23 = vadd.f32 %v3308_v40, %v1544_v59  ;;  %v1956_v29 = vmax.f32 %v1940_v3, %v1844_v24  ;;  %v1925_v19 = vmax.f32 %v1909_v51, %v1813_v28  ;;  %v1630_v3 = vadd.f32 %v3308_v40, %v3075_v15  ;;  %v3457_v24 = vld [vmem:[#allocation5_spill] sm:$0xff] }
 0x2c9   :  { %v1593_v11 = vadd.f32 %v3308_v40, %v3457_v24  ;;  %v1832_v15 = vmax.f32 %v1670_v2, 0.0 }
 0x2ca   :  { %v1782_v9 = vmax.f32 %v1545_v23, 0.0  ;;  %1972 = vxpose.xlu0.b32.cont [6/16] (narrow) %v1956_v29, 32  ;;  %v1941_v39 = vmax.f32 %v1925_v19, %v1829_v32  ;;  %v1816_v45 = vmax.f32 %v1630_v3, 0.0  ;;  %v3458_v19 = vld [vmem:[#allocation11_spill] sm:$0xff] }
 0x2cb   :  { %v1702_v27 = vpop.f32.mrf.mxu3  ;;  %v1633_v5 = vadd.f32 %v3308_v40, %v3458_v19 }
 0x2cc   :  { %v1894_v16 = vmax.f32 %v3208_v61, %v1782_v9  ;;  %v1703_v60 = vadd.f32 %v3308_v40, %v1702_v27  ;;  %v3459_v27 = vld [vmem:[#allocation18_spill] sm:$0xff] }
 0x2ce   :  { %v1910_v58 = vmax.f32 %v1894_v16, %v1798_v22  ;;  %v1845_v6 = vmax.f32 %v1703_v60, 0.0  ;;  %v1673_v22 = vadd.f32 %v3308_v40, %v3459_v27 }
 0x2cf   :  { %v1547_v12 = vpop.f32.mrf.mxu1 }
 0x2d0   :  { %v1548_v4 = vadd.f32 %v3308_v40, %v1547_v12  ;;  %v1957_v18 = vmax.f32 %v1941_v39, %v1845_v6  ;;  %v1926_v13 = vmax.f32 %v1910_v58, %v1814_v42  ;;  %v1801_v39 = vmax.f32 %v1593_v11, 0.0 }
 0x2d1   :  { %v1817_v42 = vmax.f32 %v1633_v5, 0.0  ;;  %v1595_v12 = vadd.f32 %v3308_v40, %v3461_v25  ;;  %v3468_v25 = vld [vmem:[#allocation9_spill] sm:$0xff] }
 0x2d2   :  { %v1783_v52 = vmax.f32 %v1548_v4, 0.0  ;;  %1973 = vxpose.xlu0.b32.cont [7/16] (narrow) %v1957_v18, 32  ;;  %v1942_v61 = vmax.f32 %v1926_v13, %v1830_v8  ;;  %v1833_v4 = vmax.f32 %v1673_v22, 0.0 }
 0x2d3   :  { %v1704_v36 = vpop.f32.mrf.mxu3 }
 0x2d4   :  { %v1895_v55 = vmax.f32 %v3218_v37, %v1783_v52  ;;  %v1705_v7 = vadd.f32 %v3308_v40, %v1704_v36  ;;  %v3462_v52 = vld [vmem:[#allocation12_spill] sm:$0xff] }
 0x2d6   :  { %v1911_v56 = vmax.f32 %v1895_v55, %v1799_v48  ;;  %v1846_v54 = vmax.f32 %v1705_v7, 0.0  ;;  %v1802_v55 = vmax.f32 %v1595_v12, 0.0  ;;  %v1675_v7 = vadd.f32 %v3308_v40, %v3251_v26 }
 0x2d7   :  { %v1549_v34 = vpop.f32.mrf.mxu1  ;;  %v1603_v12 = vadd.f32 %v3308_v40, %v3468_v25 }
 0x2d8   :  { %v1550_v50 = vadd.f32 %v3308_v40, %v1549_v34  ;;  %v1958_v1 = vmax.f32 %v1942_v61, %v1846_v54  ;;  %v1927_v63 = vmax.f32 %v1911_v56, %v1815_v35  ;;  %v1635_v61 = vadd.f32 %v3308_v40, %v3462_v52  ;;  %v3469_v52 = vld [vmem:[#allocation15_spill] sm:$0xff] }
 0x2da   :  { %v1784_v38 = vmax.f32 %v1550_v50, 0.0  ;;  %1974 = vxpose.xlu0.b32.cont [8/16] (narrow) %v1958_v1, 32  ;;  %v1943_v37 = vmax.f32 %v1927_v63, %v1831_v41  ;;  %v1818_v54 = vmax.f32 %v1635_v61, 0.0  ;;  %v3463_v41 = vld [vmem:[#allocation7_spill] sm:$0xff]  ;;  %v1834_v63 = vmax.f32 %v1675_v7, 0.0 }
 0x2db   :  { %v1707_v49 = vpop.f32.mrf.mxu3  ;;  %v1598_v50 = vadd.f32 %v3308_v40, %v3463_v41  ;;  %v1643_v61 = vadd.f32 %v3308_v40, %v3469_v52 }
 0x2dc   :  { %v1896_v17 = vmax.f32 %v3226_v57, %v1784_v38  ;;  %v1708_v21 = vadd.f32 %v3308_v40, %v1707_v49  ;;  %v3464_v49 = vld [vmem:[#allocation13_spill] sm:$0xff] }
 0x2de   :  { %v1912_v28 = vmax.f32 %v1896_v17, %v1800_v53  ;;  %v1847_v51 = vmax.f32 %v1708_v21, 0.0  ;;  %v1638_v53 = vadd.f32 %v3308_v40, %v3464_v49  ;;  %v1803_v17 = vmax.f32 %v1598_v50, 0.0 }
 0x2df   :  { %v1552_v59 = vpop.f32.mrf.mxu1  ;;  %v1678_v21 = vadd.f32 %v3308_v40, %v3259_v20 }
 0x2e0   :  { %v1553_v32 = vadd.f32 %v3308_v40, %v1552_v59  ;;  %v1959_v23 = vmax.f32 %v1943_v37, %v1847_v51  ;;  %v1928_v29 = vmax.f32 %v1912_v28, %v1816_v45  ;;  %v3465_v45 = vld [vmem:[#allocation19_spill] sm:$0xff]  ;;  %v1819_v24 = vmax.f32 %v1638_v53, 0.0 }
 0x2e2   :  { %v1785_v33 = vmax.f32 %v1553_v32, 0.0  ;;  %1975 = vxpose.xlu0.b32.cont [9/16] (narrow) %v1959_v23, 32  ;;  %v1944_v57 = vmax.f32 %v1928_v29, %v1832_v15  ;;  %v3466_v15 = vld [vmem:[#allocation8_spill] sm:$0xff]  ;;  %v1835_v29 = vmax.f32 %v1678_v21, 0.0 }
 0x2e3   :  { %v1709_v9 = vpop.f32.mrf.mxu3  ;;  %v1600_v32 = vadd.f32 %v3308_v40, %v3466_v15 }
 0x2e4   :  { %v1897_v16 = vmax.f32 %v3460_v62, %v1785_v33  ;;  %v1710_v60 = vadd.f32 %v3308_v40, %v1709_v9  ;;  %v1680_v62 = vadd.f32 %v3308_v40, %v3269_v47 }
 0x2e5   :  { %v1804_v22 = vmax.f32 %v1600_v32, 0.0 }
 0x2e6   :  { %v1913_v58 = vmax.f32 %v1897_v16, %v1801_v39  ;;  %v1848_v6 = vmax.f32 %v1710_v60, 0.0 }
 0x2e7   :  { %v1554_v8 = vpop.f32.mrf.mxu1 }
 0x2e8   :  { %v1555_v18 = vadd.f32 %v3308_v40, %v1554_v8  ;;  %v1960_v13 = vmax.f32 %v1944_v57, %v1848_v6  ;;  %v1929_v30 = vmax.f32 %v1913_v58, %v1817_v42  ;;  %v3467_v57 = vld [vmem:[#allocation14_spill] sm:$0xff] }
 0x2e9   :  { %v1640_v9 = vadd.f32 %v3308_v40, %v3467_v57 }
 0x2ea   :  { %v1786_v36 = vmax.f32 %v1555_v18, 0.0  ;;  %1976 = vxpose.xlu0.b32.cont [10/16] (narrow) %v1960_v13, 32  ;;  %v1945_v48 = vmax.f32 %v1929_v30, %v1833_v4  ;;  %v1836_v4 = vmax.f32 %v1680_v62, 0.0 }
 0x2eb   :  { %v1712_v14 = vpop.f32.mrf.mxu3  ;;  %v1820_v42 = vmax.f32 %v1640_v9, 0.0 }
 0x2ec   :  { %v1898_v35 = vmax.f32 %v3244_v0, %v1786_v36  ;;  %v1713_v56 = vadd.f32 %v3308_v40, %v1712_v14  ;;  %v1683_v14 = vadd.f32 %v3308_v40, %v3276_v43 }
 0x2ee   :  { %v1914_v46 = vmax.f32 %v1898_v35, %v1802_v55  ;;  %v1849_v34 = vmax.f32 %v1713_v56, 0.0  ;;  %v1821_v35 = vmax.f32 %v1643_v61, 0.0  ;;  %v1837_v50 = vmax.f32 %v1683_v14, 0.0 }
 0x2ef   :  { %v1557_v1 = vpop.f32.mrf.mxu1 }
 0x2f0   :  { %v1558_v3 = vadd.f32 %v3308_v40, %v1557_v1  ;;  %v1961_v38 = vmax.f32 %v1945_v48, %v1849_v34  ;;  %v1930_v37 = vmax.f32 %v1914_v46, %v1818_v54  ;;  %v1805_v48 = vmax.f32 %v1603_v12, 0.0  ;;  %v3470_v46 = vld [vmem:[#allocation10_spill] sm:$0xff] }
 0x2f1   :  { %v1605_v34 = vadd.f32 %v3308_v40, %v3470_v46 }
 0x2f2   :  { %v1787_v26 = vmax.f32 %v1558_v3, 0.0  ;;  %1977 = vxpose.xlu0.b32.cont [11/16] (narrow) %v1961_v38, 32  ;;  %v1946_v0 = vmax.f32 %v1930_v37, %v1834_v63  ;;  %v3471_v38 = vld [vmem:[#allocation16_spill] sm:$0xff] }
 0x2f3   :  { %v1714_v2 = vpop.f32.mrf.mxu3  ;;  %v1645_v37 = vadd.f32 %v3308_v40, %v3471_v38  ;;  %v1806_v53 = vmax.f32 %v1605_v34, 0.0 }
 0x2f4   :  { %v1899_v28 = vmax.f32 %v3465_v45, %v1787_v26  ;;  %v1715_v51 = vadd.f32 %v3308_v40, %v1714_v2  ;;  %v1685_v26 = vadd.f32 %v3308_v40, %v3286_v44 }
 0x2f5   :  { %v1822_v21 = vmax.f32 %v1645_v37, 0.0 }
 0x2f6   :  { %v1915_v11 = vmax.f32 %v1899_v28, %v1803_v17  ;;  %v1850_v59 = vmax.f32 %v1715_v51, 0.0  ;;  %v1838_v51 = vmax.f32 %v1685_v26, 0.0 }
 0x2f7   :  { %v1559_v23 = vpop.f32.mrf.mxu1 }
 0x2f8   :  { %v1560_v19 = vadd.f32 %v3308_v40, %v1559_v23  ;;  %v1962_v5 = vmax.f32 %v1946_v0, %v1850_v59  ;;  %v1931_v33 = vmax.f32 %v1915_v11, %v1819_v24  ;;  %v3472_v0 = vld [vmem:[#allocation20_spill] sm:$0xff] }
 0x2fa   :  { %v1788_v20 = vmax.f32 %v1560_v19, 0.0  ;;  %1978 = vxpose.xlu0.b32.cont [12/16] (narrow) %v1962_v5, 32  ;;  %v1947_v39 = vmax.f32 %v1931_v33, %v1835_v29 }
 0x2fb   :  { %v1717_v27 = vpop.f32.mrf.mxu3 }
 0x2fc   :  { %v1900_v16 = vmax.f32 %v3262_v10, %v1788_v20  ;;  %v1718_v60 = vadd.f32 %v3308_v40, %v1717_v27 }
 0x2fe   :  { %v1916_v58 = vmax.f32 %v1900_v16, %v1804_v22  ;;  %v1851_v6 = vmax.f32 %v1718_v60, 0.0 }
 0x2ff   :  { %v1562_v8 = vpop.f32.mrf.mxu1 }
 0x300   :  { %v1563_v18 = vadd.f32 %v3308_v40, %v1562_v8  ;;  %v1963_v13 = vmax.f32 %v1947_v39, %v1851_v6  ;;  %v1932_v30 = vmax.f32 %v1916_v58, %v1820_v42 }
 0x302   :  { %v1789_v47 = vmax.f32 %v1563_v18, 0.0  ;;  %1979 = vxpose.xlu0.b32.cont [13/16] (narrow) %v1963_v13, 32  ;;  %v1948_v10 = vmax.f32 %v1932_v30, %v1836_v4 }
 0x303   :  { %v1719_v36 = vpop.f32.mrf.mxu3 }
 0x304   :  { %v1901_v55 = vmax.f32 %v3272_v31, %v1789_v47  ;;  %v1720_v7 = vadd.f32 %v3308_v40, %v1719_v36 }
 0x306   :  { %v1917_v56 = vmax.f32 %v1901_v55, %v1805_v48  ;;  %v1852_v54 = vmax.f32 %v1720_v7, 0.0 }
 0x307   :  { %v1564_v41 = vpop.f32.mrf.mxu1 }
 0x308   :  { %v1565_v1 = vadd.f32 %v3308_v40, %v1564_v41  ;;  %v1964_v63 = vmax.f32 %v1948_v10, %v1852_v54  ;;  %v1933_v3 = vmax.f32 %v1917_v56, %v1821_v35 }
 0x30a   :  { %v1790_v43 = vmax.f32 %v1565_v1, 0.0  ;;  %1980 = vxpose.xlu0.b32.cont [14/16] (narrow) %v1964_v63, 32  ;;  %v1949_v31 = vmax.f32 %v1933_v3, %v1837_v50 }
 0x30b   :  { %v1722_v49 = vpop.f32.mrf.mxu3 }
 0x30c   :  { %v1902_v2 = vmax.f32 %v3472_v0, %v1790_v43  ;;  %v1723_v17 = vadd.f32 %v3308_v40, %v1722_v49 }
 0x30e   :  { %v1918_v45 = vmax.f32 %v1902_v2, %v1806_v53  ;;  %v1853_v28 = vmax.f32 %v1723_v17, 0.0 }
 0x310   :  { %v1965_v24 = vmax.f32 %v1949_v31, %v1853_v28  ;;  %v1934_v11 = vmax.f32 %v1918_v45, %v1822_v21 }
 0x312   :  { %1981 = vxpose.xlu0.b32.cont [15/16] (narrow) %v1965_v24, 32  ;;  %v1950_v59 = vmax.f32 %v1934_v11, %v1838_v51 }
 0x313   :  { %v1724_v15 = vpop.f32.mrf.mxu3 }
 0x314   :  { %v1725_v32 = vadd.f32 %v3308_v40, %v1724_v15 }
 0x316   :  { %v1854_v23 = vmax.f32 %v1725_v32, 0.0 }
 0x318   :  { %v1966_v29 = vmax.f32 %v1950_v59, %v1854_v23 }
 0x31a   :  { %1982 = vxpose.xlu0.b32.end [16/16] (narrow) %v1966_v29, 32 }
 0x346   :  { %v1983_v19 = vpop.trf.xlu0 }
 0x347   :  { %1999 = vst [vmem:[#allocation2] sm:$0xff] %v1983_v19 }
 0x34e   :  { %v1984_v44 = vpop.trf.xlu0 }
 0x34f   :  { %2000 = vst [vmem:[#allocation2 + $0x8] sm:$0xff] %v1984_v44 }
 0x356   :  { %v1985_v5 = vpop.trf.xlu0 }
 0x357   :  { %2001 = vst [vmem:[#allocation2 + $0x10] sm:$0xff] %v1985_v5 }
 0x35e   :  { %v1986_v33 = vpop.trf.xlu0 }
 0x35f   :  { %2002 = vst [vmem:[#allocation2 + $0x18] sm:$0xff] %v1986_v33 }
 0x360   :  { %2015 = dma.vmem_to_hbm [thread:$0]  %s2008_s22, 512, %s2010_s1, [#allocation3], %s2510_s25, %s2510_s25, %s2511_s26  }
 0x361   :  { %2507 = dma.done.wait [#allocation3], 512  }
 0x362   :  { %2508 = vsyncadd [#allocation3], 4294966784 }
 0x363   :  { %2020 = vsyncpa [#allocation3], 1 }

</bundles_post_ra>
